<compile_context>
chip_gen: v5e
topology: v5e:2x2
jax: 0.10.0
libtpu: 0.0.40
codegen_flags: <defaults>
</compile_context>

<pallas_src>
import functools

import jax
import jax.numpy as jnp
from jax.experimental import pallas as pl
from jax.experimental.pallas import tpu as pltpu


def _sym_lovasz_kernel(gts_ref, neg_err_ref, lab_ref, tri_ref, out_ref,
                       cs_carry, j_carry, acc, *, p_true, chunk, chunks_per_block):
    """One (batch_tile, pixel_block) grid step of the symmetric Lovasz hinge loss.

    gts_ref:     (tb, 1)  f32   positives per image (computed pre-sort in the wrapper).
    neg_err_ref: (tb, K*chunk) f32  NEGATED hinge errors, sorted descending (by error) per row.
    lab_ref:     (tb, K*chunk) bf16 0/1 labels permuted by the same per-row sort.
    tri_ref:     (chunk, chunk) bf16 upper-triangular ones (MXU prefix-sum matrix).
    out_ref:     (tb, 1)  f32   per-image loss1+loss2 (written once, at the last pixel block).
    cs_carry/j_carry/acc: (tb, 1) f32 VMEM scratch carried across pixel-block grid steps.
    """
    nb = pl.program_id(1)                       # pixel-block index (inner, "arbitrary" axis)
    ch = chunk

    @pl.when(nb == 0)
    def _init():
        cs_carry[...] = jnp.zeros_like(cs_carry)
        j_carry[...] = jnp.zeros_like(j_carry)
        acc[...] = jnp.zeros_like(acc)

    lane = jax.lax.broadcasted_iota(jnp.int32, (1, ch), 1)   # (1, ch); rows broadcast for free
    tri = tri_ref[...]                                       # (ch, ch) bf16
    gts = gts_ref[...]                                       # (tb, 1) positives of labels g
    gts2 = float(p_true) - gts                               # positives of mirrored labels 1-g

    blk_off = nb * (chunks_per_block * ch)                   # global pixel offset of this block
    cs_c = cs_carry[...]
    j_c = j_carry[...]
    a = acc[...]

    for k in range(chunks_per_block):                        # static, short, unrolled
        sl = slice(k * ch, (k + 1) * ch)
        # relu(errors): the wrapper passes -errors, fold the sign flip into the max.
        hinge = jnp.maximum(-neg_err_ref[:, sl], 0.0)
        # Inclusive prefix sum of the sorted 0/1 labels on the MXU (bf16 x bf16 -> f32; exact).
        cs = jnp.dot(lab_ref[:, sl], tri, preferred_element_type=jnp.float32) + cs_c
        pos = (lane + (1 + k * ch) + blk_off).astype(jnp.float32)   # 1-based global position
        cs2 = pos - cs                                       # cumsum of (1 - g)
        # Jaccard sequences for labels = g and for the symmetric labels = 1 - g.
        j1 = 1.0 - (gts - cs) / (gts + cs2)
        j2 = 1.0 - (gts2 - cs2) / (gts2 + cs)
        jsum = j1 + j2
        # lovasz_grad: grad_i = J_i - J_{i-1}; J_{-1} := 0, carried across chunk boundaries.
        prev = jnp.where(lane >= 1, pltpu.roll(jsum, 1, axis=1), j_c)
        a = a + jnp.sum(hinge * (jsum - prev), axis=-1, keepdims=True)
        cs_c = cs[:, ch - 1:ch]
        j_c = jsum[:, ch - 1:ch]

    cs_carry[...] = cs_c
    j_carry[...] = j_c
    acc[...] = a

    @pl.when(nb == pl.num_programs(1) - 1)
    def _fin():
        out_ref[...] = acc[...]


def _vmem_capacity_bytes():
    """Per-core VMEM capacity; conservative fallback if the trace-time query is unavailable."""
    try:
        cap = getattr(pltpu.get_tpu_info(), "vmem_capacity_bytes", None)
        if cap:
            return int(cap)
    except Exception:
        pass
    return 64 * 1024 * 1024      # v7x per-TensorCore size; v5e/v6e have 128 MiB


def _pick_rows(batch, block_px, chunk, block_rows, vmem_limit):
    """Rows per batch tile: fits VMEM (incl. double-buffered inputs), 16-row aligned for bf16."""
    if block_rows is not None:
        tb = max(1, min(int(block_rows), batch))
    else:
        # dbl-buffered f32+bf16 inputs per row + chunk-sized f32 temporaries.
        per_row = 14 * block_px + 40 * chunk + 64
        budget = max(vmem_limit - (4 << 20), 1 << 20)
        tb = max(1, budget // per_row)
        if batch >= 32:
            tb = min(tb, -(-batch // 2))     # >=2 batch tiles so v7x megacore can split them
    if tb >= batch:
        return batch                          # full-dim block: any row count is legal
    return max(16, (tb // 16) * 16)           # bf16-friendly sublane alignment


def symmetric_lovasz_loss(logits, targets, ignore=None, block_rows=None,
                          chunk=256, chunks_per_block=None):
    """Pallas TPU implementation of SymmetricLovaszLoss.forward (per_image=True)."""
    if ignore is not None:
        # TODO(synk): ignore-label filtering needs ragged per-image pixel sets; not implemented.
        raise NotImplementedError("ignore labels are not supported")
    assert chunk % 128 == 0

    b = logits.shape[0]
    # squeeze(1) + per-image flatten (channel dim is 1, so a plain flatten is identical).
    lg = logits.reshape(b, -1).astype(jnp.float32)
    tg = targets.reshape(b, -1).astype(jnp.float32)
    p = lg.shape[1]

    signs = 2.0 * tg - 1.0
    neg_errors = lg * signs - 1.0                 # = -(1 - lg*signs); shared by both symmetric terms
    gts = jnp.sum(tg, axis=1, keepdims=True)      # positives per image (sort-invariant)
    labels_bf = tg.astype(jnp.bfloat16)           # 0/1 exact; halves the label HBM stream

    # Ascending sort of -errors == descending sort of errors; labels ride along as payload.
    # TODO(synk): per-image descending sort has no Pallas TPU equivalent; done with lax.sort.
    neg_sorted, lab_sorted = jax.lax.sort_key_val(neg_errors, labels_bf, dimension=-1)

    nct = pl.cdiv(p, chunk)
    k_blk = int(chunks_per_block) if chunks_per_block is not None else min(8, nct)
    k_blk = max(1, min(k_blk, nct))
    block_px = k_blk * chunk
    npx = pl.cdiv(p, block_px)
    p_pad = npx * block_px

    vmem_cap = _vmem_capacity_bytes()
    vmem_limit = min(int(vmem_cap * 7 // 10), 100 * 1024 * 1024)
    tb = _pick_rows(b, block_px, chunk, block_rows, vmem_limit)
    nbt = pl.cdiv(b, tb)
    b_pad = nbt * tb

    # Zero padding: padded pixels/rows have label 0 and -error 0 -> relu(error)=0, finite
    # denominators, zero contribution; padded batch rows are sliced off before the mean.
    if (b_pad, p_pad) != (b, p):
        neg_sorted = jnp.pad(neg_sorted, ((0, b_pad - b), (0, p_pad - p)))
        lab_sorted = jnp.pad(lab_sorted, ((0, b_pad - b), (0, p_pad - p)))
    if b_pad != b:
        gts = jnp.pad(gts, ((0, b_pad - b), (0, 0)))

    tri = jnp.triu(jnp.ones((chunk, chunk), dtype=jnp.bfloat16))   # M[d,c]=1 iff d<=c

    kernel = functools.partial(_sym_lovasz_kernel, p_true=p, chunk=chunk,
                               chunks_per_block=k_blk)
    per_image = pl.pallas_call(
        kernel,
        out_shape=jax.ShapeDtypeStruct((b_pad, 1), jnp.float32),
        grid_spec=pltpu.PrefetchScalarGridSpec(
            num_scalar_prefetch=0,
            grid=(nbt, npx),
            in_specs=[
                pl.BlockSpec((tb, 1), lambda i, n: (i, 0)),          # positives per image
                pl.BlockSpec((tb, block_px), lambda i, n: (i, n)),   # -errors, sorted descending
                pl.BlockSpec((tb, block_px), lambda i, n: (i, n)),   # co-sorted labels (bf16)
                pl.BlockSpec((chunk, chunk), lambda i, n: (0, 0)),   # upper-tri ones (resident)
            ],
            out_specs=pl.BlockSpec((tb, 1), lambda i, n: (i, 0)),
            scratch_shapes=[pltpu.VMEM((tb, 1), jnp.float32)] * 3,   # cs carry, jsum carry, acc
        ),
        compiler_params=pltpu.CompilerParams(
            dimension_semantics=("parallel", "arbitrary"),
            vmem_limit_bytes=int(vmem_limit),
        ),
    )(gts, neg_sorted, lab_sorted, tri)

    # 0.5 for the symmetric average, mean over the (unpadded) batch.
    return 0.5 * jnp.mean(per_image[:b, 0])


# ----------------------------- pure-JAX reference -----------------------------

def _lovasz_hinge_flat_ref(logits, labels):
    signs = 2.0 * labels - 1.0
    errors = 1.0 - logits * signs
    perm = jnp.argsort(-errors)
    errors_sorted = errors[perm]
    gt_sorted = labels[perm]
    gts = jnp.sum(gt_sorted)
    cs = jnp.cumsum(gt_sorted)
    intersection = gts - cs
    union = gts + jnp.cumsum(1.0 - gt_sorted)
    jaccard = 1.0 - intersection / union
    grad = jnp.concatenate([jaccard[:1], jaccard[1:] - jaccard[:-1]])
    return jnp.dot(jnp.maximum(errors_sorted, 0.0), grad)


def _reference(logits, targets):
    b = logits.shape[0]
    lg = logits.reshape(b, -1).astype(jnp.float32)
    tg = targets.reshape(b, -1).astype(jnp.float32)
    f = jax.vmap(_lovasz_hinge_flat_ref)
    return (jnp.mean(f(lg, tg)) + jnp.mean(f(-lg, 1.0 - tg))) / 2.0


if __name__ == "__main__":
    key = jax.random.PRNGKey(0)
    k1, k2, k3, k4 = jax.random.split(key, 4)

    # Config 1: pixels a multiple of the 256-lane chunk; 4 chunks processed in one grid step.
    B, H, W = 16, 32, 32
    logits = jax.random.normal(k1, (B, 1, H, W), dtype=jnp.float32)
    targets = (jax.random.uniform(k2, (B, 1, H, W)) > 0.5).astype(jnp.float32)
    loss = jax.block_until_ready(symmetric_lovasz_loss(logits, targets))
    ref = _reference(logits, targets)
    assert jnp.allclose(loss, ref, atol=1e-5, rtol=1e-5), (loss, ref)

    # Config 2: non-aligned pixels (400 -> 512 pad), batch padding (24 -> 32), 2x2 grid,
    # exercising the cross-step cumsum/jaccard carries and the multi-batch-tile path.
    B, H, W = 24, 20, 20
    logits = jax.random.normal(k3, (B, 1, H, W), dtype=jnp.float32)
    targets = (jax.random.uniform(k4, (B, 1, H, W)) > 0.5).astype(jnp.float32)
    loss = jax.block_until_ready(
        symmetric_lovasz_loss(logits, targets, block_rows=16, chunks_per_block=1))
    ref = _reference(logits, targets)
    assert jnp.allclose(loss, ref, atol=1e-5, rtol=1e-5), (loss, ref)

    print("KERNEL_OK")
</pallas_src>

<mosaic_0001>
module attributes {stable_mosaic.version = 11 : i64} {
  func.func @_sym_lovasz_kernel(%arg0: i32, %arg1: i32, %arg2: memref<16x1xf32, #tpu.memory_space<vmem>>, %arg3: memref<16x1024xf32, #tpu.memory_space<vmem>>, %arg4: memref<16x1024xbf16, #tpu.memory_space<vmem>>, %arg5: memref<256x256xbf16, #tpu.memory_space<vmem>>, %arg6: memref<16x1xf32, #tpu.memory_space<vmem>>, %arg7: memref<16x1xf32, #tpu.memory_space<vmem>>, %arg8: memref<16x1xf32, #tpu.memory_space<vmem>>, %arg9: memref<16x1xf32, #tpu.memory_space<vmem>>) attributes {dimension_semantics = [#tpu.dimension_semantics<parallel>, #tpu.dimension_semantics<arbitrary>], iteration_bounds = array<i64: 1, 1>, scalar_prefetch = 0 : i64, scratch_operands = 3 : i64, tpu.core_type = #tpu.core_type<tc>, window_params = [{transform_indices = @transform_0, window_bounds = array<i64: 16, 1>}, {transform_indices = @transform_1, window_bounds = array<i64: 16, 1024>}, {transform_indices = @transform_2, window_bounds = array<i64: 16, 1024>}, {pipeline_mode = #tpu.pipeline_mode<synchronous>, transform_indices = @transform_3, window_bounds = array<i64: 256, 256>}, {transform_indices = @transform_4, window_bounds = array<i64: 16, 1>}]} {
    %c0_i32 = arith.constant 0 : i32
    %0 = arith.cmpi eq, %arg1, %c0_i32 : i32
    %1 = arith.extui %0 : i1 to i32
    %c0_i32_0 = arith.constant 0 : i32
    %2 = arith.cmpi ne, %1, %c0_i32_0 : i32
    scf.if %2 {
      %cst_63 = arith.constant 0.000000e+00 : f32
      %202 = vector.broadcast %cst_63 : f32 to vector<16x1xf32>
      %c0_64 = arith.constant 0 : index
      %c0_65 = arith.constant 0 : index
      %203 = vector.load %arg7[%c0_64, %c0_65] : memref<16x1xf32, #tpu.memory_space<vmem>>, vector<16x1xf32>
      tpu.vector_store %arg7[%c0_64, %c0_65], %202 {strides = array<i32>} : memref<16x1xf32, #tpu.memory_space<vmem>>, vector<16x1xf32>,
      %cst_66 = arith.constant 0.000000e+00 : f32
      %204 = vector.broadcast %cst_66 : f32 to vector<16x1xf32>
      %c0_67 = arith.constant 0 : index
      %c0_68 = arith.constant 0 : index
      %205 = vector.load %arg8[%c0_67, %c0_68] : memref<16x1xf32, #tpu.memory_space<vmem>>, vector<16x1xf32>
      tpu.vector_store %arg8[%c0_67, %c0_68], %204 {strides = array<i32>} : memref<16x1xf32, #tpu.memory_space<vmem>>, vector<16x1xf32>,
      %cst_69 = arith.constant 0.000000e+00 : f32
      %206 = vector.broadcast %cst_69 : f32 to vector<16x1xf32>
      %c0_70 = arith.constant 0 : index
      %c0_71 = arith.constant 0 : index
      %207 = vector.load %arg9[%c0_70, %c0_71] : memref<16x1xf32, #tpu.memory_space<vmem>>, vector<16x1xf32>
      tpu.vector_store %arg9[%c0_70, %c0_71], %206 {strides = array<i32>} : memref<16x1xf32, #tpu.memory_space<vmem>>, vector<16x1xf32>,
    } else {
    }
    %3 = tpu.iota {dimensions = array<i32: 1>} : vector<1x256xi32>
    %c0 = arith.constant 0 : index
    %c0_1 = arith.constant 0 : index
    %4 = vector.load %arg5[%c0, %c0_1] : memref<256x256xbf16, #tpu.memory_space<vmem>>, vector<256x256xbf16>
    %c0_2 = arith.constant 0 : index
    %c0_3 = arith.constant 0 : index
    %5 = vector.load %arg2[%c0_2, %c0_3] : memref<16x1xf32, #tpu.memory_space<vmem>>, vector<16x1xf32>
    %cst = arith.constant 1.024000e+03 : f32
    %6 = vector.broadcast %cst : f32 to vector<16x1xf32>
    %7 = arith.subf %6, %5 : vector<16x1xf32>
    %c1024_i32 = arith.constant 1024 : i32
    %8 = arith.muli %arg1, %c1024_i32 : i32
    %c0_4 = arith.constant 0 : index
    %c0_5 = arith.constant 0 : index
    %9 = vector.load %arg7[%c0_4, %c0_5] : memref<16x1xf32, #tpu.memory_space<vmem>>, vector<16x1xf32>
    %c0_6 = arith.constant 0 : index
    %c0_7 = arith.constant 0 : index
    %10 = vector.load %arg8[%c0_6, %c0_7] : memref<16x1xf32, #tpu.memory_space<vmem>>, vector<16x1xf32>
    %c0_8 = arith.constant 0 : index
    %c0_9 = arith.constant 0 : index
    %11 = vector.load %arg9[%c0_8, %c0_9] : memref<16x1xf32, #tpu.memory_space<vmem>>, vector<16x1xf32>
    %c0_10 = arith.constant 0 : index
    %c0_11 = arith.constant 0 : index
    %12 = vector.load %arg3[%c0_10, %c0_11] : memref<16x1024xf32, #tpu.memory_space<vmem>>, vector<16x256xf32>
    %cst_12 = arith.constant 0.000000e+00 : f32
    %13 = vector.broadcast %cst_12 : f32 to vector<16x256xf32>
    %14 = arith.subf %13, %12 : vector<16x256xf32>
    %cst_13 = arith.constant 0.000000e+00 : f32
    %15 = vector.broadcast %cst_13 : f32 to vector<16x256xf32>
    %16 = arith.maximumf %14, %15 : vector<16x256xf32>
    %c0_14 = arith.constant 0 : index
    %c0_15 = arith.constant 0 : index
    %17 = vector.load %arg4[%c0_14, %c0_15] : memref<16x1024xbf16, #tpu.memory_space<vmem>>, vector<16x256xbf16>
    %cst_16 = arith.constant dense<0.000000e+00> : vector<16x256xf32>
    %18 = tpu.matmul %17, %4, %cst_16 {dimension_numbers = #tpu.dot_dimension_numbers<[1], [0], [0], [1], [0, 0, 1, 1], [], []>} : vector<16x256xbf16>, vector<256x256xbf16>, vector<16x256xf32> -> vector<16x256xf32>
    %19 = vector.broadcast %9 : vector<16x1xf32> to vector<16x256xf32>
    %20 = arith.addf %18, %19 : vector<16x256xf32>
    %c1_i32 = arith.constant 1 : i32
    %21 = vector.broadcast %c1_i32 : i32 to vector<1x256xi32>
    %22 = arith.addi %3, %21 : vector<1x256xi32>
    %23 = vector.broadcast %8 : i32 to vector<1x256xi32>
    %24 = arith.addi %22, %23 : vector<1x256xi32>
    %25 = arith.sitofp %24 : vector<1x256xi32> to vector<1x256xf32>
    %26 = vector.broadcast %25 : vector<1x256xf32> to vector<16x256xf32>
    %27 = arith.subf %26, %20 : vector<16x256xf32>
    %28 = vector.broadcast %5 : vector<16x1xf32> to vector<16x256xf32>
    %29 = arith.subf %28, %20 : vector<16x256xf32>
    %30 = vector.broadcast %5 : vector<16x1xf32> to vector<16x256xf32>
    %31 = arith.addf %30, %27 : vector<16x256xf32>
    %32 = arith.divf %29, %31 : vector<16x256xf32>
    %cst_17 = arith.constant 1.000000e+00 : f32
    %33 = vector.broadcast %cst_17 : f32 to vector<16x256xf32>
    %34 = arith.subf %33, %32 : vector<16x256xf32>
    %35 = vector.broadcast %7 : vector<16x1xf32> to vector<16x256xf32>
    %36 = arith.subf %35, %27 : vector<16x256xf32>
    %37 = vector.broadcast %7 : vector<16x1xf32> to vector<16x256xf32>
    %38 = arith.addf %37, %20 : vector<16x256xf32>
    %39 = arith.divf %36, %38 : vector<16x256xf32>
    %cst_18 = arith.constant 1.000000e+00 : f32
    %40 = vector.broadcast %cst_18 : f32 to vector<16x256xf32>
    %41 = arith.subf %40, %39 : vector<16x256xf32>
    %42 = arith.addf %34, %41 : vector<16x256xf32>
    %c1_i32_19 = arith.constant 1 : i32
    %43 = vector.broadcast %c1_i32_19 : i32 to vector<1x256xi32>
    %44 = arith.cmpi sge, %3, %43 : vector<1x256xi32>
    %c1_i32_20 = arith.constant 1 : i32
    %45 = tpu.dynamic_rotate %42 by %c1_i32_20 dim 1 : vector<16x256xf32>, i32 -> vector<16x256xf32>
    %46 = vector.shape_cast %44 : vector<1x256xi1> to vector<1x256xi1>
    %47 = vector.broadcast %46 : vector<1x256xi1> to vector<16x256xi1>
    %48 = vector.shape_cast %10 : vector<16x1xf32> to vector<16x1xf32>
    %49 = vector.broadcast %48 : vector<16x1xf32> to vector<16x256xf32>
    %50 = arith.select %47, %45, %49 : vector<16x256xi1>, vector<16x256xf32>
    %51 = arith.subf %42, %50 : vector<16x256xf32>
    %52 = arith.mulf %16, %51 : vector<16x256xf32>
    %cst_21 = arith.constant dense<0.000000e+00> : vector<16xf32>
    %53 = vector.multi_reduction <add>, %52, %cst_21 [1] : vector<16x256xf32> to vector<16xf32>
    %54 = vector.shape_cast %53 : vector<16xf32> to vector<16x1xf32>
    %55 = arith.addf %11, %54 : vector<16x1xf32>
    %56 = vector.extract_strided_slice %20 {offsets = [0, 255], sizes = [16, 1], strides = [1, 1]} : vector<16x256xf32> to vector<16x1xf32>
    %57 = vector.extract_strided_slice %42 {offsets = [0, 255], sizes = [16, 1], strides = [1, 1]} : vector<16x256xf32> to vector<16x1xf32>
    %c0_22 = arith.constant 0 : index
    %c256 = arith.constant 256 : index
    %58 = vector.load %arg3[%c0_22, %c256] : memref<16x1024xf32, #tpu.memory_space<vmem>>, vector<16x256xf32>
    %cst_23 = arith.constant 0.000000e+00 : f32
    %59 = vector.broadcast %cst_23 : f32 to vector<16x256xf32>
    %60 = arith.subf %59, %58 : vector<16x256xf32>
    %cst_24 = arith.constant 0.000000e+00 : f32
    %61 = vector.broadcast %cst_24 : f32 to vector<16x256xf32>
    %62 = arith.maximumf %60, %61 : vector<16x256xf32>
    %c0_25 = arith.constant 0 : index
    %c256_26 = arith.constant 256 : index
    %63 = vector.load %arg4[%c0_25, %c256_26] : memref<16x1024xbf16, #tpu.memory_space<vmem>>, vector<16x256xbf16>
    %cst_27 = arith.constant dense<0.000000e+00> : vector<16x256xf32>
    %64 = tpu.matmul %63, %4, %cst_27 {dimension_numbers = #tpu.dot_dimension_numbers<[1], [0], [0], [1], [0, 0, 1, 1], [], []>} : vector<16x256xbf16>, vector<256x256xbf16>, vector<16x256xf32> -> vector<16x256xf32>
    %65 = vector.broadcast %56 : vector<16x1xf32> to vector<16x256xf32>
    %66 = arith.addf %64, %65 : vector<16x256xf32>
    %c257_i32 = arith.constant 257 : i32
    %67 = vector.broadcast %c257_i32 : i32 to vector<1x256xi32>
    %68 = arith.addi %3, %67 : vector<1x256xi32>
    %69 = vector.broadcast %8 : i32 to vector<1x256xi32>
    %70 = arith.addi %68, %69 : vector<1x256xi32>
    %71 = arith.sitofp %70 : vector<1x256xi32> to vector<1x256xf32>
    %72 = vector.broadcast %71 : vector<1x256xf32> to vector<16x256xf32>
    %73 = arith.subf %72, %66 : vector<16x256xf32>
    %74 = vector.broadcast %5 : vector<16x1xf32> to vector<16x256xf32>
    %75 = arith.subf %74, %66 : vector<16x256xf32>
    %76 = vector.broadcast %5 : vector<16x1xf32> to vector<16x256xf32>
    %77 = arith.addf %76, %73 : vector<16x256xf32>
    %78 = arith.divf %75, %77 : vector<16x256xf32>
    %cst_28 = arith.constant 1.000000e+00 : f32
    %79 = vector.broadcast %cst_28 : f32 to vector<16x256xf32>
    %80 = arith.subf %79, %78 : vector<16x256xf32>
    %81 = vector.broadcast %7 : vector<16x1xf32> to vector<16x256xf32>
    %82 = arith.subf %81, %73 : vector<16x256xf32>
    %83 = vector.broadcast %7 : vector<16x1xf32> to vector<16x256xf32>
    %84 = arith.addf %83, %66 : vector<16x256xf32>
    %85 = arith.divf %82, %84 : vector<16x256xf32>
    %cst_29 = arith.constant 1.000000e+00 : f32
    %86 = vector.broadcast %cst_29 : f32 to vector<16x256xf32>
    %87 = arith.subf %86, %85 : vector<16x256xf32>
    %88 = arith.addf %80, %87 : vector<16x256xf32>
    %c1_i32_30 = arith.constant 1 : i32
    %89 = vector.broadcast %c1_i32_30 : i32 to vector<1x256xi32>
    %90 = arith.cmpi sge, %3, %89 : vector<1x256xi32>
    %c1_i32_31 = arith.constant 1 : i32
    %91 = tpu.dynamic_rotate %88 by %c1_i32_31 dim 1 : vector<16x256xf32>, i32 -> vector<16x256xf32>
    %92 = vector.shape_cast %90 : vector<1x256xi1> to vector<1x256xi1>
    %93 = vector.broadcast %92 : vector<1x256xi1> to vector<16x256xi1>
    %94 = vector.shape_cast %57 : vector<16x1xf32> to vector<16x1xf32>
    %95 = vector.broadcast %94 : vector<16x1xf32> to vector<16x256xf32>
    %96 = arith.select %93, %91, %95 : vector<16x256xi1>, vector<16x256xf32>
    %97 = arith.subf %88, %96 : vector<16x256xf32>
    %98 = arith.mulf %62, %97 : vector<16x256xf32>
    %cst_32 = arith.constant dense<0.000000e+00> : vector<16xf32>
    %99 = vector.multi_reduction <add>, %98, %cst_32 [1] : vector<16x256xf32> to vector<16xf32>
    %100 = vector.shape_cast %99 : vector<16xf32> to vector<16x1xf32>
    %101 = arith.addf %55, %100 : vector<16x1xf32>
    %102 = vector.extract_strided_slice %66 {offsets = [0, 255], sizes = [16, 1], strides = [1, 1]} : vector<16x256xf32> to vector<16x1xf32>
    %103 = vector.extract_strided_slice %88 {offsets = [0, 255], sizes = [16, 1], strides = [1, 1]} : vector<16x256xf32> to vector<16x1xf32>
    %c0_33 = arith.constant 0 : index
    %c512 = arith.constant 512 : index
    %104 = vector.load %arg3[%c0_33, %c512] : memref<16x1024xf32, #tpu.memory_space<vmem>>, vector<16x256xf32>
    %cst_34 = arith.constant 0.000000e+00 : f32
    %105 = vector.broadcast %cst_34 : f32 to vector<16x256xf32>
    %106 = arith.subf %105, %104 : vector<16x256xf32>
    %cst_35 = arith.constant 0.000000e+00 : f32
    %107 = vector.broadcast %cst_35 : f32 to vector<16x256xf32>
    %108 = arith.maximumf %106, %107 : vector<16x256xf32>
    %c0_36 = arith.constant 0 : index
    %c512_37 = arith.constant 512 : index
    %109 = vector.load %arg4[%c0_36, %c512_37] : memref<16x1024xbf16, #tpu.memory_space<vmem>>, vector<16x256xbf16>
    %cst_38 = arith.constant dense<0.000000e+00> : vector<16x256xf32>
    %110 = tpu.matmul %109, %4, %cst_38 {dimension_numbers = #tpu.dot_dimension_numbers<[1], [0], [0], [1], [0, 0, 1, 1], [], []>} : vector<16x256xbf16>, vector<256x256xbf16>, vector<16x256xf32> -> vector<16x256xf32>
    %111 = vector.broadcast %102 : vector<16x1xf32> to vector<16x256xf32>
    %112 = arith.addf %110, %111 : vector<16x256xf32>
    %c513_i32 = arith.constant 513 : i32
    %113 = vector.broadcast %c513_i32 : i32 to vector<1x256xi32>
    %114 = arith.addi %3, %113 : vector<1x256xi32>
    %115 = vector.broadcast %8 : i32 to vector<1x256xi32>
    %116 = arith.addi %114, %115 : vector<1x256xi32>
    %117 = arith.sitofp %116 : vector<1x256xi32> to vector<1x256xf32>
    %118 = vector.broadcast %117 : vector<1x256xf32> to vector<16x256xf32>
    %119 = arith.subf %118, %112 : vector<16x256xf32>
    %120 = vector.broadcast %5 : vector<16x1xf32> to vector<16x256xf32>
    %121 = arith.subf %120, %112 : vector<16x256xf32>
    %122 = vector.broadcast %5 : vector<16x1xf32> to vector<16x256xf32>
    %123 = arith.addf %122, %119 : vector<16x256xf32>
    %124 = arith.divf %121, %123 : vector<16x256xf32>
    %cst_39 = arith.constant 1.000000e+00 : f32
    %125 = vector.broadcast %cst_39 : f32 to vector<16x256xf32>
    %126 = arith.subf %125, %124 : vector<16x256xf32>
    %127 = vector.broadcast %7 : vector<16x1xf32> to vector<16x256xf32>
    %128 = arith.subf %127, %119 : vector<16x256xf32>
    %129 = vector.broadcast %7 : vector<16x1xf32> to vector<16x256xf32>
    %130 = arith.addf %129, %112 : vector<16x256xf32>
    %131 = arith.divf %128, %130 : vector<16x256xf32>
    %cst_40 = arith.constant 1.000000e+00 : f32
    %132 = vector.broadcast %cst_40 : f32 to vector<16x256xf32>
    %133 = arith.subf %132, %131 : vector<16x256xf32>
    %134 = arith.addf %126, %133 : vector<16x256xf32>
    %c1_i32_41 = arith.constant 1 : i32
    %135 = vector.broadcast %c1_i32_41 : i32 to vector<1x256xi32>
    %136 = arith.cmpi sge, %3, %135 : vector<1x256xi32>
    %c1_i32_42 = arith.constant 1 : i32
    %137 = tpu.dynamic_rotate %134 by %c1_i32_42 dim 1 : vector<16x256xf32>, i32 -> vector<16x256xf32>
    %138 = vector.shape_cast %136 : vector<1x256xi1> to vector<1x256xi1>
    %139 = vector.broadcast %138 : vector<1x256xi1> to vector<16x256xi1>
    %140 = vector.shape_cast %103 : vector<16x1xf32> to vector<16x1xf32>
    %141 = vector.broadcast %140 : vector<16x1xf32> to vector<16x256xf32>
    %142 = arith.select %139, %137, %141 : vector<16x256xi1>, vector<16x256xf32>
    %143 = arith.subf %134, %142 : vector<16x256xf32>
    %144 = arith.mulf %108, %143 : vector<16x256xf32>
    %cst_43 = arith.constant dense<0.000000e+00> : vector<16xf32>
    %145 = vector.multi_reduction <add>, %144, %cst_43 [1] : vector<16x256xf32> to vector<16xf32>
    %146 = vector.shape_cast %145 : vector<16xf32> to vector<16x1xf32>
    %147 = arith.addf %101, %146 : vector<16x1xf32>
    %148 = vector.extract_strided_slice %112 {offsets = [0, 255], sizes = [16, 1], strides = [1, 1]} : vector<16x256xf32> to vector<16x1xf32>
    %149 = vector.extract_strided_slice %134 {offsets = [0, 255], sizes = [16, 1], strides = [1, 1]} : vector<16x256xf32> to vector<16x1xf32>
    %c0_44 = arith.constant 0 : index
    %c768 = arith.constant 768 : index
    %150 = vector.load %arg3[%c0_44, %c768] : memref<16x1024xf32, #tpu.memory_space<vmem>>, vector<16x256xf32>
    %cst_45 = arith.constant 0.000000e+00 : f32
    %151 = vector.broadcast %cst_45 : f32 to vector<16x256xf32>
    %152 = arith.subf %151, %150 : vector<16x256xf32>
    %cst_46 = arith.constant 0.000000e+00 : f32
    %153 = vector.broadcast %cst_46 : f32 to vector<16x256xf32>
    %154 = arith.maximumf %152, %153 : vector<16x256xf32>
    %c0_47 = arith.constant 0 : index
    %c768_48 = arith.constant 768 : index
    %155 = vector.load %arg4[%c0_47, %c768_48] : memref<16x1024xbf16, #tpu.memory_space<vmem>>, vector<16x256xbf16>
    %cst_49 = arith.constant dense<0.000000e+00> : vector<16x256xf32>
    %156 = tpu.matmul %155, %4, %cst_49 {dimension_numbers = #tpu.dot_dimension_numbers<[1], [0], [0], [1], [0, 0, 1, 1], [], []>} : vector<16x256xbf16>, vector<256x256xbf16>, vector<16x256xf32> -> vector<16x256xf32>
    %157 = vector.broadcast %148 : vector<16x1xf32> to vector<16x256xf32>
    %158 = arith.addf %156, %157 : vector<16x256xf32>
    %c769_i32 = arith.constant 769 : i32
    %159 = vector.broadcast %c769_i32 : i32 to vector<1x256xi32>
    %160 = arith.addi %3, %159 : vector<1x256xi32>
    %161 = vector.broadcast %8 : i32 to vector<1x256xi32>
    %162 = arith.addi %160, %161 : vector<1x256xi32>
    %163 = arith.sitofp %162 : vector<1x256xi32> to vector<1x256xf32>
    %164 = vector.broadcast %163 : vector<1x256xf32> to vector<16x256xf32>
    %165 = arith.subf %164, %158 : vector<16x256xf32>
    %166 = vector.broadcast %5 : vector<16x1xf32> to vector<16x256xf32>
    %167 = arith.subf %166, %158 : vector<16x256xf32>
    %168 = vector.broadcast %5 : vector<16x1xf32> to vector<16x256xf32>
    %169 = arith.addf %168, %165 : vector<16x256xf32>
    %170 = arith.divf %167, %169 : vector<16x256xf32>
    %cst_50 = arith.constant 1.000000e+00 : f32
    %171 = vector.broadcast %cst_50 : f32 to vector<16x256xf32>
    %172 = arith.subf %171, %170 : vector<16x256xf32>
    %173 = vector.broadcast %7 : vector<16x1xf32> to vector<16x256xf32>
    %174 = arith.subf %173, %165 : vector<16x256xf32>
    %175 = vector.broadcast %7 : vector<16x1xf32> to vector<16x256xf32>
    %176 = arith.addf %175, %158 : vector<16x256xf32>
    %177 = arith.divf %174, %176 : vector<16x256xf32>
    %cst_51 = arith.constant 1.000000e+00 : f32
    %178 = vector.broadcast %cst_51 : f32 to vector<16x256xf32>
    %179 = arith.subf %178, %177 : vector<16x256xf32>
    %180 = arith.addf %172, %179 : vector<16x256xf32>
    %c1_i32_52 = arith.constant 1 : i32
    %181 = vector.broadcast %c1_i32_52 : i32 to vector<1x256xi32>
    %182 = arith.cmpi sge, %3, %181 : vector<1x256xi32>
    %c1_i32_53 = arith.constant 1 : i32
    %183 = tpu.dynamic_rotate %180 by %c1_i32_53 dim 1 : vector<16x256xf32>, i32 -> vector<16x256xf32>
    %184 = vector.shape_cast %182 : vector<1x256xi1> to vector<1x256xi1>
    %185 = vector.broadcast %184 : vector<1x256xi1> to vector<16x256xi1>
    %186 = vector.shape_cast %149 : vector<16x1xf32> to vector<16x1xf32>
    %187 = vector.broadcast %186 : vector<16x1xf32> to vector<16x256xf32>
    %188 = arith.select %185, %183, %187 : vector<16x256xi1>, vector<16x256xf32>
    %189 = arith.subf %180, %188 : vector<16x256xf32>
    %190 = arith.mulf %154, %189 : vector<16x256xf32>
    %cst_54 = arith.constant dense<0.000000e+00> : vector<16xf32>
    %191 = vector.multi_reduction <add>, %190, %cst_54 [1] : vector<16x256xf32> to vector<16xf32>
    %192 = vector.shape_cast %191 : vector<16xf32> to vector<16x1xf32>
    %193 = arith.addf %147, %192 : vector<16x1xf32>
    %194 = vector.extract_strided_slice %158 {offsets = [0, 255], sizes = [16, 1], strides = [1, 1]} : vector<16x256xf32> to vector<16x1xf32>
    %195 = vector.extract_strided_slice %180 {offsets = [0, 255], sizes = [16, 1], strides = [1, 1]} : vector<16x256xf32> to vector<16x1xf32>
    %c0_55 = arith.constant 0 : index
    %c0_56 = arith.constant 0 : index
    %196 = vector.load %arg7[%c0_55, %c0_56] : memref<16x1xf32, #tpu.memory_space<vmem>>, vector<16x1xf32>
    tpu.vector_store %arg7[%c0_55, %c0_56], %194 {strides = array<i32>} : memref<16x1xf32, #tpu.memory_space<vmem>>, vector<16x1xf32>,
    %c0_57 = arith.constant 0 : index
    %c0_58 = arith.constant 0 : index
    %197 = vector.load %arg8[%c0_57, %c0_58] : memref<16x1xf32, #tpu.memory_space<vmem>>, vector<16x1xf32>
    tpu.vector_store %arg8[%c0_57, %c0_58], %195 {strides = array<i32>} : memref<16x1xf32, #tpu.memory_space<vmem>>, vector<16x1xf32>,
    %c0_59 = arith.constant 0 : index
    %c0_60 = arith.constant 0 : index
    %198 = vector.load %arg9[%c0_59, %c0_60] : memref<16x1xf32, #tpu.memory_space<vmem>>, vector<16x1xf32>
    tpu.vector_store %arg9[%c0_59, %c0_60], %193 {strides = array<i32>} : memref<16x1xf32, #tpu.memory_space<vmem>>, vector<16x1xf32>,
    %c0_i32_61 = arith.constant 0 : i32
    %199 = arith.cmpi eq, %arg1, %c0_i32_61 : i32
    %200 = arith.extui %199 : i1 to i32
    %c0_i32_62 = arith.constant 0 : i32
    %201 = arith.cmpi ne, %200, %c0_i32_62 : i32
    scf.if %201 {
      %c0_63 = arith.constant 0 : index
      %c0_64 = arith.constant 0 : index
      %202 = vector.load %arg9[%c0_63, %c0_64] : memref<16x1xf32, #tpu.memory_space<vmem>>, vector<16x1xf32>
      %c0_65 = arith.constant 0 : index
      %c0_66 = arith.constant 0 : index
      %203 = vector.load %arg6[%c0_65, %c0_66] : memref<16x1xf32, #tpu.memory_space<vmem>>, vector<16x1xf32>
      tpu.vector_store %arg6[%c0_65, %c0_66], %202 {strides = array<i32>} : memref<16x1xf32, #tpu.memory_space<vmem>>, vector<16x1xf32>,
    } else {
    }
    return
  }
  func.func @transform_0(%arg0: i32, %arg1: i32) -> (i32, i32) {
    %c0_i32 = arith.constant 0 : i32
    %c0_i32_0 = arith.constant 0 : i32
    return %arg0, %c0_i32 : i32, i32
  }
  func.func @transform_1(%arg0: i32, %arg1: i32) -> (i32, i32) {
    %c0_i32 = arith.constant 0 : i32
    return %arg0, %arg1 : i32, i32
  }
  func.func @transform_2(%arg0: i32, %arg1: i32) -> (i32, i32) {
    %c0_i32 = arith.constant 0 : i32
    return %arg0, %arg1 : i32, i32
  }
  func.func @transform_3(%arg0: i32, %arg1: i32) -> (i32, i32) {
    %c0_i32 = arith.constant 0 : i32
    %c0_i32_0 = arith.constant 0 : i32
    %c0_i32_1 = arith.constant 0 : i32
    return %c0_i32, %c0_i32_0 : i32, i32
  }
  func.func @transform_4(%arg0: i32, %arg1: i32) -> (i32, i32) {
    %c0_i32 = arith.constant 0 : i32
    %c0_i32_0 = arith.constant 0 : i32
    return %arg0, %c0_i32 : i32, i32
  }
}

</mosaic_0001>

<bundles_post_ra>
// kernel: tpu_custom_call.1
= control target key start
LH: loop header
LB: loop body
LE: loop exit
PB: predicated region body
PF: predicated region fallthrough
CT: control target
= control target key end

     0   :  { %9 = vsyncpa [#allocation6], 0  ;;  %s2917_s0 = inlined_call_operand.vmem [shape: f32[16,1], index: 0, kind: input, shape index: {}]   ;;  %s2918_s1 = inlined_call_operand.hbm [shape: f32[16,1024], index: 1, kind: input, shape index: {}]   ;;  %s2919_s2 = inlined_call_operand.hbm [shape: bf16[16,1024], index: 2, kind: input, shape index: {}]   ;;  %s2920_s3 = inlined_call_operand.hbm [shape: bf16[256,256], index: 3, kind: input, shape index: {}]   ;;  %s2921_s4 = inlined_call_operand.vmem [shape: f32[16,1], index: 4, kind: output, shape index: {}]  }
   0x1   :  { %10 = vsyncpa [#allocation8], 0  ;;  %s30_s17 = sshll.u32 %s2919_s2, 4  ;;  %s1863_s18 = smov [#allocation7]   ;;  %s31_s17 = int_to_ptr.hbm [resolvable:$true] %s30_s17 }
   0x2   :  { %s32_s19 = sshll.u32 %s1863_s18, 4  ;;  %s17_s22 = sshll.u32 %s2918_s1, 4  ;;  %s33_s19 = int_to_ptr.vmem [resolvable:$true] %s32_s19  ;;  %s18_s22 = int_to_ptr.hbm [resolvable:$true] %s17_s22 }
   0x3   :  { %s1864_s23 = smov 512   ;;  %s1865_s24 = smov 32  }
   0x4   :  { %38 = dma.hbm_to_vmem [thread:$0]  %s31_s17, 1024, %s33_s19, [#allocation8], %s1864_s23, %s1864_s23, %s1865_s24  }
   0x5   :  { %s1866_s25 = smov [#allocation5]   ;;  %s1867_s27 = smov 1024  }
   0x6   :  { %s19_s26 = sshll.u32 %s1866_s25, 4  ;;  %s1868_s28 = smov 64   ;;  %s20_s26 = int_to_ptr.vmem [resolvable:$true] %s19_s26 }
   0x7   :  { %25 = dma.hbm_to_vmem [thread:$0]  %s18_s22, 2048, %s20_s26, [#allocation6], %s1867_s27, %s1867_s27, %s1868_s28  }
   0x8   :  { %s43_s30 = sshll.u32 %s2920_s3, 4  ;;  %s1869_s5 = smov [#allocation9]   ;;  %s44_s30 = int_to_ptr.hbm [resolvable:$true] %s43_s30 }
   0x9   :  { %s45_s6 = sshll.u32 %s1869_s5, 4  ;;  %s1870_s7 = smov 128   ;;  %s46_s6 = int_to_ptr.vmem [resolvable:$true] %s45_s6 }
   0xa   :  { %s1871_s1 = smov 8  }
   0xb   :  { %51 = dma.hbm_to_vmem [thread:$0]  %s44_s30, 4096, %s46_s6, [#allocation8], %s1870_s7, %s1870_s7, %s1871_s1  }
   0xc   :  { %1859 = dma.done.wait [#allocation6], 2048  }
   0xd   :  { %1860 = vsyncadd [#allocation6], 4294965248 }
   0xe   :  { %1861 = dma.done.wait [#allocation8], 5120  }
   0xf   :  { %1862 = vsyncadd [#allocation8], 4294962176  ;;  %vm2922_vm0 = vcmask 7168   ;;  %v1872_v0 = vmov 0   ;;  %v1873_v1 = vmov 0.0  }
  0x10   :  { %1718 = vset.pattern.permute.xlu0 %v1872_v0  ;;  %69 = vst.msk [vmem:[#allocation2] sm:$0xff] %vm2922_vm0, %v1873_v1  ;;  %1719 = vset.pattern.permute.xlu1 %v1872_v0  ;;  %v1571_v2 = vld [vmem:[#allocation9 + $0x70] sm:$0xf]  ;;  %v1680_v3 = vld [vmem:[#allocation9 + $0x74] sm:$0xf0] }
  0x11   :  { %70 = vst.msk [vmem:[#allocation2 + $0x8] sm:$0xff] %vm2922_vm0, %v1873_v1  ;;  %v1679_v4 = vld [vmem:[#allocation9 + $0x74] sm:$0xf]  ;;  %v1916_v5 = vor.u32 %v1680_v3, %v1571_v2  ;;  %v1573_v6 = vld [vmem:[#allocation9 + $0x78] sm:$0xf0] }
  0x12   :  { %71 = vst.msk [vmem:[#allocation3] sm:$0xff] %vm2922_vm0, %v1873_v1  ;;  %v1695_v7 = vld [vmem:[#allocation9 + $0xf4] sm:$0xf]  ;;  %v1637_v8 = vld [vmem:[#allocation9 + $0xf8] sm:$0xf0]  ;;  %v1918_v9 = vor.u32 %v1679_v4, %v1573_v6 }
  0x13   :  { %72 = vst.msk [vmem:[#allocation3 + $0x8] sm:$0xff] %vm2922_vm0, %v1873_v1  ;;  %v1920_v10 = vor.u32 %v1695_v7, %v1637_v8  ;;  %v1635_v11 = vld [vmem:[#allocation9 + $0xf0] sm:$0xf]  ;;  %v1696_v12 = vld [vmem:[#allocation9 + $0xf4] sm:$0xf0]  ;;  %315 = vmatpush.bf16.msra.mxu0 %v1916_v5 }
  0x14   :  { %73 = vst.msk [vmem:[#allocation4] sm:$0xff] %vm2922_vm0, %v1873_v1  ;;  %v1563_v13 = vld [vmem:[#allocation9 + $0x60] sm:$0xf]  ;;  %v1923_v14 = vor.u32 %v1696_v12, %v1635_v11  ;;  %v1678_v15 = vld [vmem:[#allocation9 + $0x64] sm:$0xf0]  ;;  %343 = vmatpush.bf16.msra.mxu2 %v1918_v9 }
  0x15   :  { %74 = vst.msk [vmem:[#allocation4 + $0x8] sm:$0xff] %vm2922_vm0, %v1873_v1  ;;  %v1677_v16 = vld [vmem:[#allocation9 + $0x64] sm:$0xf]  ;;  %v1565_v17 = vld [vmem:[#allocation9 + $0x68] sm:$0xf0]  ;;  %357 = vmatpush.bf16.msra.mxu3 %v1920_v10  ;;  %v1927_v18 = vor.u32 %v1678_v15, %v1563_v13 }
  0x16   :  { %v1929_v19 = vor.u32 %v1677_v16, %v1565_v17  ;;  %v1693_v20 = vld [vmem:[#allocation9 + $0xe4] sm:$0xf]  ;;  %v1629_v21 = vld [vmem:[#allocation9 + $0xe8] sm:$0xf0]  ;;  %v1627_v22 = vld [vmem:[#allocation9 + $0xe0] sm:$0xf]  ;;  %329 = vmatpush.bf16.msra.mxu1 %v1923_v14 }
  0x17   :  { %v1932_v23 = vor.u32 %v1693_v20, %v1629_v21  ;;  %v1694_v24 = vld [vmem:[#allocation9 + $0xe4] sm:$0xf0]  ;;  %v1555_v25 = vld [vmem:[#allocation9 + $0x50] sm:$0xf]  ;;  %v1676_v26 = vld [vmem:[#allocation9 + $0x54] sm:$0xf0]  ;;  %316 = vmatpush.bf16.msra.mxu0 %v1927_v18 }
  0x18   :  { %v1934_v27 = vor.u32 %v1694_v24, %v1627_v22  ;;  %v1675_v28 = vld [vmem:[#allocation9 + $0x54] sm:$0xf]  ;;  %v1557_v29 = vld [vmem:[#allocation9 + $0x58] sm:$0xf0]  ;;  %v1937_v31 = vor.u32 %v1676_v26, %v1555_v25  ;;  %v1619_v33 = vld [vmem:[#allocation9 + $0xd0] sm:$0xf]  ;;  %344 = vmatpush.bf16.msra.mxu2 %v1929_v19 }
  0x19   :  { %v1691_v30 = vld [vmem:[#allocation9 + $0xd4] sm:$0xf]  ;;  %v1621_v32 = vld [vmem:[#allocation9 + $0xd8] sm:$0xf0]  ;;  %v1692_v34 = vld [vmem:[#allocation9 + $0xd4] sm:$0xf0]  ;;  %358 = vmatpush.bf16.msra.mxu3 %v1932_v23  ;;  %v1941_v35 = vor.u32 %v1675_v28, %v1557_v29 }
  0x1a   :  { %v1943_v36 = vor.u32 %v1691_v30, %v1621_v32  ;;  %v1547_v37 = vld [vmem:[#allocation9 + $0x40] sm:$0xf]  ;;  %v1674_v38 = vld [vmem:[#allocation9 + $0x44] sm:$0xf0]  ;;  %v1673_v39 = vld [vmem:[#allocation9 + $0x44] sm:$0xf]  ;;  %330 = vmatpush.bf16.msra.mxu1 %v1934_v27  ;;  %v1946_v40 = vor.u32 %v1692_v34, %v1619_v33 }
  0x1b   :  { %v1549_v41 = vld [vmem:[#allocation9 + $0x48] sm:$0xf0]  ;;  %v1689_v42 = vld [vmem:[#allocation9 + $0xc4] sm:$0xf]  ;;  %v1611_v44 = vld [vmem:[#allocation9 + $0xc0] sm:$0xf]  ;;  %317 = vmatpush.bf16.msra.mxu0 %v1937_v31  ;;  %v1949_v46 = vor.u32 %v1674_v38, %v1547_v37 }
  0x1c   :  { %v1613_v43 = vld [vmem:[#allocation9 + $0xc8] sm:$0xf0]  ;;  %v1690_v45 = vld [vmem:[#allocation9 + $0xc4] sm:$0xf0]  ;;  %v1539_v47 = vld [vmem:[#allocation9 + $0x30] sm:$0xf]  ;;  %345 = vmatpush.bf16.msra.mxu2 %v1941_v35  ;;  %v1953_v48 = vor.u32 %v1673_v39, %v1549_v41 }
  0x1d   :  { %359 = vmatpush.bf16.msra.mxu3 %v1943_v36  ;;  %v1955_v49 = vor.u32 %v1689_v42, %v1613_v43  ;;  %v1672_v50 = vld [vmem:[#allocation9 + $0x34] sm:$0xf0]  ;;  %v1671_v51 = vld [vmem:[#allocation9 + $0x34] sm:$0xf]  ;;  %v1958_v53 = vor.u32 %v1690_v45, %v1611_v44  ;;  %v1541_v54 = vld [vmem:[#allocation9 + $0x38] sm:$0xf0] }
  0x1e   :  { %v115_v52 = vld [vmem:[#allocation2] sm:$0xff]  ;;  %331 = vmatpush.bf16.msra.mxu1 %v1946_v40  ;;  %v1605_v56 = vld [vmem:[#allocation9 + $0xb8] sm:$0xf0]  ;;  %v1688_v58 = vld [vmem:[#allocation9 + $0xb4] sm:$0xf0]  ;;  %v1961_v59 = vor.u32 %v1672_v50, %v1539_v47  ;;  %v1965_v60 = vor.u32 %v1671_v51, %v1541_v54 }
  0x1f   :  { %v1687_v55 = vld [vmem:[#allocation9 + $0xb4] sm:$0xf]  ;;  %137 = vperm.xlu0 %1718, %v115_v52   ;;  %v1603_v57 = vld [vmem:[#allocation9 + $0xb0] sm:$0xf]  ;;  %318 = vmatpush.bf16.msra.mxu0 %v1949_v46  ;;  %v1531_v62 = vld [vmem:[#allocation9 + $0x20] sm:$0xf] }
  0x20   :  { %346 = vmatpush.bf16.msra.mxu2 %v1953_v48  ;;  %v1967_v61 = vor.u32 %v1687_v55, %v1605_v56  ;;  %v1670_v63 = vld [vmem:[#allocation9 + $0x24] sm:$0xf0]  ;;  %v1669_v0 = vld [vmem:[#allocation9 + $0x24] sm:$0xf]  ;;  %v1970_v1 = vor.u32 %v1688_v58, %v1603_v57  ;;  %v1533_v2 = vld [vmem:[#allocation9 + $0x28] sm:$0xf0] }
  0x21   :  { %360 = vmatpush.bf16.msra.mxu3 %v1955_v49  ;;  %v1685_v3 = vld [vmem:[#allocation9 + $0xa4] sm:$0xf]  ;;  %v1597_v4 = vld [vmem:[#allocation9 + $0xa8] sm:$0xf0]  ;;  %v1595_v6 = vld [vmem:[#allocation9 + $0xa0] sm:$0xf]  ;;  %v1973_v11 = vor.u32 %v1670_v63, %v1531_v62  ;;  %v1977_v12 = vor.u32 %v1669_v0, %v1533_v2 }
  0x22   :  { %332 = vmatpush.bf16.msra.mxu1 %v1958_v53  ;;  %v1686_v7 = vld [vmem:[#allocation9 + $0xa4] sm:$0xf0]  ;;  %v116_v8 = vld [vmem:[#allocation2 + $0x8] sm:$0xff]  ;;  %v1979_v13 = vor.u32 %v1685_v3, %v1597_v4  ;;  %v1523_v15 = vld [vmem:[#allocation9 + $0x10] sm:$0xf] }
  0x23   :  { %319 = vmatpush.bf16.msra.mxu0 %v1961_v59  ;;  %v1668_v16 = vld [vmem:[#allocation9 + $0x14] sm:$0xf0]  ;;  %v1667_v17 = vld [vmem:[#allocation9 + $0x14] sm:$0xf]  ;;  %v1982_v20 = vor.u32 %v1686_v7, %v1595_v6  ;;  %v1525_v21 = vld [vmem:[#allocation9 + $0x18] sm:$0xf0] }
  0x24   :  { %347 = vmatpush.bf16.msra.mxu2 %v1965_v60  ;;  %v1683_v22 = vld [vmem:[#allocation9 + $0x94] sm:$0xf]  ;;  %v1589_v24 = vld [vmem:[#allocation9 + $0x98] sm:$0xf0]  ;;  %v1587_v25 = vld [vmem:[#allocation9 + $0x90] sm:$0xf]  ;;  %v1985_v28 = vor.u32 %v1668_v16, %v1523_v15  ;;  %v1992_v32 = vor.u32 %v1667_v17, %v1525_v21 }
  0x25   :  { %361 = vmatpush.bf16.msra.mxu3 %v1967_v61  ;;  %v1684_v26 = vld [vmem:[#allocation9 + $0x94] sm:$0xf0]  ;;  %v1515_v29 = vld [vmem:[#allocation9] sm:$0xf]  ;;  %v110_v30 = vld [vmem:[%s2917_s0] sm:$0xff]  ;;  %v1994_v33 = vor.u32 %v1683_v22, %v1589_v24 }
  0x26   :  { %333 = vmatpush.bf16.msra.mxu1 %v1970_v1  ;;  %v1666_v34 = vld [vmem:[#allocation9 + $0x4] sm:$0xf0]  ;;  %v1665_v37 = vld [vmem:[#allocation9 + $0x4] sm:$0xf]  ;;  %v1517_v38 = vld [vmem:[#allocation9 + $0x8] sm:$0xf0]  ;;  %v1997_v39 = vor.u32 %v1684_v26, %v1587_v25  ;;  %384 = vperm.xlu1 %1719, %v110_v30  }
  0x27   :  { %142 = vperm.xlu0 %1718, %v116_v8   ;;  %320 = vmatpush.bf16.msra.mxu0 %v1973_v11  ;;  %v1681_v41 = vld [vmem:[#allocation9 + $0x84] sm:$0xf]  ;;  %v1581_v42 = vld [vmem:[#allocation9 + $0x88] sm:$0xf0]  ;;  %v112_v43 = vsub.f32 1024.0, %v110_v30  ;;  %v2000_v47 = vor.u32 %v1666_v34, %v1515_v29  ;;  %v2004_v52 = vor.u32 %v1665_v37, %v1517_v38  ;;  %v111_v62 = vld [vmem:[%s2917_s0 + $0x8] sm:$0xff] }
  0x28   :  { %348 = vmatpush.bf16.msra.mxu2 %v1977_v12  ;;  %v1579_v44 = vld [vmem:[#allocation9 + $0x80] sm:$0xf]  ;;  %v1682_v45 = vld [vmem:[#allocation9 + $0x84] sm:$0xf0]  ;;  %v2006_v54 = vor.u32 %v1681_v41, %v1581_v42  ;;  %v1697_v55 = vld [vmem:[#allocation7 + $0x4] sm:$0xf] }
  0x29   :  { %362 = vmatpush.bf16.msra.mxu3 %v1979_v13  ;;  %v1507_v50 = vld [vmem:[#allocation7] sm:$0xf]  ;;  %v1509_v56 = vld [vmem:[#allocation7 + $0x20] sm:$0xf0]  ;;  %v2009_v57 = vor.u32 %v1682_v45, %v1579_v44  ;;  %v113_v2 = vsub.f32 1024.0, %v111_v62  ;;  %v118_v3 = vld [vmem:[#allocation3 + $0x8] sm:$0xff] }
  0x2a   :  { %334 = vmatpush.bf16.msra.mxu1 %v1982_v20  ;;  %v1698_v51 = vld [vmem:[#allocation7 + $0x1c] sm:$0xf0]  ;;  %v1512_v63 = vor.u32 %v1697_v55, %v1509_v56  ;;  %v1643_v4 = vld [vmem:[#allocation7 + $0x8] sm:$0xf]  ;;  %v1699_v7 = vld [vmem:[#allocation7 + $0xc] sm:$0xf] }
  0x2b   :  { %321 = vmatpush.bf16.msra.mxu0 %v1985_v28  ;;  %v1508_v58 = vor.u32 %v1698_v51, %v1507_v50  ;;  %v117_v0 = vld [vmem:[#allocation3] sm:$0xff]  ;;  %v1700_v6 = vld [vmem:[#allocation7 + $0x24] sm:$0xf0]  ;;  %v1645_v8 = vld [vmem:[#allocation7 + $0x28] sm:$0xf0]  ;;  %s1875_s0 = smov 1  }
  0x2c   :  { %349 = vmatpush.bf16.msra.mxu2 %v1992_v32  ;;  %v1644_v15 = vor.u32 %v1700_v6, %v1643_v4  ;;  %v1648_v16 = vor.u32 %v1699_v7, %v1645_v8 }
  0x2d   :  { %363 = vmatpush.bf16.msra.mxu3 %v1994_v33 }
  0x2e   :  { %335 = vmatpush.bf16.msra.mxu1 %v1997_v39  ;;  %389 = vperm.xlu1 %1719, %v111_v62  }
  0x2f   :  { %466 = vperm.xlu0 %1718, %v112_v43   ;;  %322 = vmatpush.bf16.msra.mxu0 %v2000_v47 }
  0x30   :  { %350 = vmatpush.bf16.msra.mxu2 %v2004_v52 }
  0x31   :  { %364 = vmatpush.bf16.msra.mxu3 %v2006_v54 }
  0x32   :  { %336 = vmatpush.bf16.msra.mxu1 %v2009_v57  ;;  %323 = vmatmul.bf16.vlgmr.msra.gmra.mxu0 %v1508_v58 }
  0x33   :  { %351 = vmatmul.bf16.vlgmr.msra.gmra.mxu2 %v1508_v58  ;;  %633 = vmatpush.bf16.msrb.mxu0 %v1916_v5 }
  0x34   :  { %661 = vmatpush.bf16.msrb.mxu2 %v1918_v9  ;;  %365 = vmatmul.bf16.vlgmr.msra.gmra.mxu3 %v1512_v63 }
  0x35   :  { %337 = vmatmul.bf16.vlgmr.msra.gmra.mxu1 %v1512_v63  ;;  %675 = vmatpush.bf16.msrb.mxu3 %v1920_v10 }
  0x36   :  { %647 = vmatpush.bf16.msrb.mxu1 %v1923_v14  ;;  %471 = vperm.xlu1 %1719, %v113_v2  }
  0x37   :  { %571 = vperm.xlu0 %1718, %v117_v0   ;;  %634 = vmatpush.bf16.msrb.mxu0 %v1927_v18 }
  0x38   :  { %662 = vmatpush.bf16.msrb.mxu2 %v1929_v19 }
  0x39   :  { %676 = vmatpush.bf16.msrb.mxu3 %v1932_v23 }
  0x3a   :  { %648 = vmatpush.bf16.msrb.mxu1 %v1934_v27 }
  0x3b   :  { %635 = vmatpush.bf16.msrb.mxu0 %v1937_v31 }
  0x3c   :  { %663 = vmatpush.bf16.msrb.mxu2 %v1941_v35 }
  0x3d   :  { %677 = vmatpush.bf16.msrb.mxu3 %v1943_v36 }
  0x3e   :  { %649 = vmatpush.bf16.msrb.mxu1 %v1946_v40 }
  0x3f   :  { %576 = vperm.xlu0 %1718, %v118_v3   ;;  %636 = vmatpush.bf16.msrb.mxu0 %v1949_v46 }
  0x40   :  { %664 = vmatpush.bf16.msrb.mxu2 %v1953_v48 }
  0x41   :  { %678 = vmatpush.bf16.msrb.mxu3 %v1955_v49 }
  0x42   :  { %650 = vmatpush.bf16.msrb.mxu1 %v1958_v53 }
  0x43   :  { %637 = vmatpush.bf16.msrb.mxu0 %v1961_v59 }
  0x44   :  { %665 = vmatpush.bf16.msrb.mxu2 %v1965_v60 }
  0x45   :  { %679 = vmatpush.bf16.msrb.mxu3 %v1967_v61 }
  0x46   :  { %651 = vmatpush.bf16.msrb.mxu1 %v1970_v1 }
  0x47   :  { %638 = vmatpush.bf16.msrb.mxu0 %v1973_v11 }
  0x48   :  { %666 = vmatpush.bf16.msrb.mxu2 %v1977_v12 }
  0x49   :  { %680 = vmatpush.bf16.msrb.mxu3 %v1979_v13 }
  0x4a   :  { %652 = vmatpush.bf16.msrb.mxu1 %v1982_v20 }
  0x4b   :  { %639 = vmatpush.bf16.msrb.mxu0 %v1985_v28 }
  0x4c   :  { %667 = vmatpush.bf16.msrb.mxu2 %v1992_v32 }
  0x4d   :  { %681 = vmatpush.bf16.msrb.mxu3 %v1994_v33 }
  0x4e   :  { %653 = vmatpush.bf16.msrb.mxu1 %v1997_v39 }
  0x4f   :  { %640 = vmatpush.bf16.msrb.mxu0 %v2000_v47 }
  0x50   :  { %668 = vmatpush.bf16.msrb.mxu2 %v2004_v52 }
  0x51   :  { %682 = vmatpush.bf16.msrb.mxu3 %v2006_v54 }
  0x52   :  { %654 = vmatpush.bf16.msrb.mxu1 %v2009_v57  ;;  %641 = vmatmul.bf16.vlgmr.msrb.gmra.mxu0 %v1644_v15 }
  0x53   :  { %669 = vmatmul.bf16.vlgmr.msrb.gmra.mxu2 %v1644_v15  ;;  %923 = vmatpush.bf16.msra.mxu0 %v1916_v5 }
  0x54   :  { %951 = vmatpush.bf16.msra.mxu2 %v1918_v9  ;;  %683 = vmatmul.bf16.vlgmr.msrb.gmra.mxu3 %v1648_v16 }
  0x55   :  { %965 = vmatpush.bf16.msra.mxu3 %v1920_v10  ;;  %655 = vmatmul.bf16.vlgmr.msrb.gmra.mxu1 %v1648_v16 }
  0x56   :  { %937 = vmatpush.bf16.msra.mxu1 %v1923_v14 }
  0x57   :  { %924 = vmatpush.bf16.msra.mxu0 %v1927_v18 }
  0x58   :  { %952 = vmatpush.bf16.msra.mxu2 %v1929_v19 }
  0x59   :  { %966 = vmatpush.bf16.msra.mxu3 %v1932_v23 }
  0x5a   :  { %938 = vmatpush.bf16.msra.mxu1 %v1934_v27 }
  0x5b   :  { %925 = vmatpush.bf16.msra.mxu0 %v1937_v31 }
  0x5c   :  { %953 = vmatpush.bf16.msra.mxu2 %v1941_v35 }
  0x5d   :  { %967 = vmatpush.bf16.msra.mxu3 %v1943_v36 }
  0x5e   :  { %939 = vmatpush.bf16.msra.mxu1 %v1946_v40 }
  0x5f   :  { %926 = vmatpush.bf16.msra.mxu0 %v1949_v46 }
  0x60   :  { %954 = vmatpush.bf16.msra.mxu2 %v1953_v48 }
  0x61   :  { %968 = vmatpush.bf16.msra.mxu3 %v1955_v49 }
  0x62   :  { %940 = vmatpush.bf16.msra.mxu1 %v1958_v53 }
  0x63   :  { %927 = vmatpush.bf16.msra.mxu0 %v1961_v59 }
  0x64   :  { %955 = vmatpush.bf16.msra.mxu2 %v1965_v60 }
  0x65   :  { %969 = vmatpush.bf16.msra.mxu3 %v1967_v61 }
  0x66   :  { %941 = vmatpush.bf16.msra.mxu1 %v1970_v1 }
  0x67   :  { %928 = vmatpush.bf16.msra.mxu0 %v1973_v11 }
  0x68   :  { %956 = vmatpush.bf16.msra.mxu2 %v1977_v12 }
  0x69   :  { %970 = vmatpush.bf16.msra.mxu3 %v1979_v13 }
  0x6a   :  { %942 = vmatpush.bf16.msra.mxu1 %v1982_v20 }
  0x6b   :  { %929 = vmatpush.bf16.msra.mxu0 %v1985_v28 }
  0x6c   :  { %957 = vmatpush.bf16.msra.mxu2 %v1992_v32 }
  0x6d   :  { %971 = vmatpush.bf16.msra.mxu3 %v1994_v33 }
  0x6e   :  { %943 = vmatpush.bf16.msra.mxu1 %v1997_v39 }
  0x6f   :  { %930 = vmatpush.bf16.msra.mxu0 %v2000_v47 }
  0x70   :  { %958 = vmatpush.bf16.msra.mxu2 %v2004_v52 }
  0x71   :  { %972 = vmatpush.bf16.msra.mxu3 %v2006_v54 }
  0x72   :  { %944 = vmatpush.bf16.msra.mxu1 %v2009_v57 }
  0x73   :  { %1213 = vmatpush.bf16.msrb.mxu0 %v1916_v5  ;;  %v1874_v5 = vmov 127  }
  0x74   :  { %1241 = vmatpush.bf16.msrb.mxu2 %v1918_v9  ;;  %1720 = vset.pattern.permute.xlu2 %v1874_v5 }
  0x75   :  { %1255 = vmatpush.bf16.msrb.mxu3 %v1920_v10  ;;  %1721 = vset.pattern.permute.xlu0 %v1874_v5  ;;  %v75_v10 = vlaneseq }
  0x76   :  { %1227 = vmatpush.bf16.msrb.mxu1 %v1923_v14  ;;  %1722 = vset.pattern.permute.xlu1 %v1874_v5 }
  0x77   :  { %1214 = vmatpush.bf16.msrb.mxu0 %v1927_v18  ;;  %v2114_v14 = vand.u32 127, %v75_v10 }
  0x78   :  { %1242 = vmatpush.bf16.msrb.mxu2 %v1929_v19 }
  0x79   :  { %1256 = vmatpush.bf16.msrb.mxu3 %v1932_v23  ;;  %v371_v23 = vadd.s32 1, %v2114_v14 }
  0x7a   :  { %1228 = vmatpush.bf16.msrb.mxu1 %v1934_v27 }
  0x7b   :  { %1215 = vmatpush.bf16.msrb.mxu0 %v1937_v31  ;;  %v2120_v31 = vadd.s32 128, %v2114_v14 }
  0x7c   :  { %1243 = vmatpush.bf16.msrb.mxu2 %v1941_v35 }
  0x7d   :  { %1257 = vmatpush.bf16.msrb.mxu3 %v1943_v36  ;;  %v376_v36 = vcvt.s32.f32 %v371_v23 }
  0x7e   :  { %1229 = vmatpush.bf16.msrb.mxu1 %v1946_v40 }
  0x7f   :  { %1216 = vmatpush.bf16.msrb.mxu0 %v1949_v46 }
  0x80   :  { %1244 = vmatpush.bf16.msrb.mxu2 %v1953_v48 }
  0x81   :  { %1258 = vmatpush.bf16.msrb.mxu3 %v1955_v49  ;;  %v372_v49 = vadd.s32 1, %v2120_v31 }
  0x82   :  { %1230 = vmatpush.bf16.msrb.mxu1 %v1958_v53 }
  0x83   :  { %1217 = vmatpush.bf16.msrb.mxu0 %v1961_v59 }
  0x84   :  { %1245 = vmatpush.bf16.msrb.mxu2 %v1965_v60 }
  0x85   :  { %1259 = vmatpush.bf16.msrb.mxu3 %v1967_v61 }
  0x86   :  { %1231 = vmatpush.bf16.msrb.mxu1 %v1970_v1 }
  0x87   :  { %1218 = vmatpush.bf16.msrb.mxu0 %v1973_v11 }
  0x88   :  { %1246 = vmatpush.bf16.msrb.mxu2 %v1977_v12 }
  0x89   :  { %1260 = vmatpush.bf16.msrb.mxu3 %v1979_v13  ;;  %v377_v13 = vcvt.s32.f32 %v372_v49 }
  0x8a   :  { %1232 = vmatpush.bf16.msrb.mxu1 %v1982_v20 }
  0x8b   :  { %1219 = vmatpush.bf16.msrb.mxu0 %v1985_v28 }
  0x8c   :  { %1247 = vmatpush.bf16.msrb.mxu2 %v1992_v32 }
  0x8d   :  { %1261 = vmatpush.bf16.msrb.mxu3 %v1994_v33 }
  0x8e   :  { %1233 = vmatpush.bf16.msrb.mxu1 %v1997_v39 }
  0x8f   :  { %1220 = vmatpush.bf16.msrb.mxu0 %v2000_v47 }
  0x90   :  { %1248 = vmatpush.bf16.msrb.mxu2 %v2004_v52 }
  0x91   :  { %1262 = vmatpush.bf16.msrb.mxu3 %v2006_v54  ;;  %v138_v9 = vpop.permute.xlu0 %137 }
  0x92   :  { %1234 = vmatpush.bf16.msrb.mxu1 %v2009_v57 }
  0x98   :  { %v2116_v19 = vpop.permute.xlu1 %384 }
  0x99   :  { %v143_v18 = vpop.permute.xlu0 %142 }
  0xa0   :  { %v2132_v60 = vpop.permute.xlu1 %389 }
  0xa1   :  { %v2124_v48 = vpop.permute.xlu0 %466 }
  0xa8   :  { %v2175_v51 = vpop.permute.xlu1 %471 }
  0xaf   :  { %v324_v27 = vpop.f32.mrf.mxu0 }
  0xb0   :  { %v325_v35 = vadd.f32 %v324_v27, %v138_v9 }
  0xb2   :  { %v338_v40 = vpop.f32.mrf.mxu1 }
  0xb3   :  { %v2122_v46 = vadd.f32 %v338_v40, %v325_v35 }
  0xb5   :  { %v2128_v53 = vsub.f32 %v376_v36, %v2122_v46  ;;  %v478_v59 = vadd.f32 %v2124_v48, %v2122_v46  ;;  %v392_v28 = vsub.f32 %v2116_v19, %v2122_v46 }
  0xb6   :  { %v352_v1 = vpop.f32.mrf.mxu2 }
  0xb7   :  { %v2136_v61 = vadd.f32 %v2116_v19, %v2128_v53  ;;  %1723 = vrcp.f32 %v478_v59  ;;  %v366_v11 = vpop.f32.mrf.mxu3  ;;  %v353_v12 = vadd.f32 %v352_v1, %v138_v9  ;;  %v326_v17 = vpop.f32.mrf.mxu0  ;;  %v491_v25 = vand.u32 2147483647, %v478_v59 }
  0xb8   :  { %v327_v20 = vadd.f32 %v326_v17, %v143_v18  ;;  %v493_v26 = vand.u32 2147483648, %v478_v59  ;;  %v474_v33 = vsub.f32 %v2124_v48, %v2128_v53  ;;  %vm487_vm1 = vweird.f32 %v478_v59 }
  0xb9   :  { %1725 = vrcp.f32 %v2136_v61  ;;  %v2139_v21 = vadd.f32 %v366_v11, %v353_v12  ;;  %v409_v37 = vand.u32 2147483647, %v2136_v61  ;;  %v411_v38 = vand.u32 2147483648, %v2136_v61 }
  0xba   :  { %v340_v22 = vpop.f32.mrf.mxu1  ;;  %vm405_vm2 = vweird.f32 %v2136_v61  ;;  %vm2170_vm3 = vcmp.eq.f32.partialorder %v491_v25, 8.507059e+37  ;;  %v494_v47 = vor.u32 1.1754944e-38, %v493_v26 }
  0xbb   :  { %v2141_v24 = vadd.f32 %v340_v22, %v327_v20  ;;  %v2146_v29 = vsub.f32 %v377_v13, %v2139_v21  ;;  %v2150_v30 = vadd.f32 %v2124_v48, %v2139_v21  ;;  %615 = vperm.xlu2 %1720, %v2139_v21   ;;  %vm2179_vm4 = vcmp.eq.f32.partialorder %v409_v37, 8.507059e+37 }
  0xbc   :  { %v412_v57 = vor.u32 1.1754944e-38, %v411_v38 }
  0xbd   :  { %v1724_v32 = vpop.eup %1723  ;;  %v2156_v34 = vsub.f32 %v376_v36, %v2141_v24  ;;  %v2162_v41 = vadd.f32 %v2116_v19, %v2146_v29  ;;  %1727 = vrcp.f32 %v2150_v30  ;;  %v506_v58 = vand.u32 2147483647, %v2150_v30 }
  0xbe   :  { %v483_v39 = vmul.f32 %v1724_v32, %v478_v59  ;;  %v354_v44 = vpop.f32.mrf.mxu2  ;;  %vm488_vm5 = vweird.f32 %v1724_v32  ;;  %v475_v2 = vsub.f32 %v2124_v48, %v2146_v29  ;;  %vm502_vm7 = vweird.f32 %v2150_v30 }
  0xbf   :  { %v1726_v42 = vpop.eup %1725  ;;  %v2167_v43 = vadd.f32 %v2132_v60, %v2156_v34  ;;  %1729 = vrcp.f32 %v2162_v41  ;;  %v355_v52 = vadd.f32 %v354_v44, %v143_v18  ;;  %v368_v55 = vpop.f32.mrf.mxu3  ;;  %v2191_v3 = vadd.f32 %v2175_v51, %v2141_v24  ;;  %vm489_vm8 = vmor %vm487_vm1, %vm488_vm5 }
  0xc0   :  { %v484_v50 = vsub.f32 1.0, %v483_v39  ;;  %v401_v54 = vmul.f32 %v1726_v42, %v2136_v61  ;;  %vm406_vm6 = vweird.f32 %v1726_v42  ;;  %v424_v15 = vand.u32 2147483647, %v2162_v41 }
  0xc1   :  { %1731 = vrcp.f32 %v2167_v43  ;;  %v2184_v62 = vadd.f32 %v368_v55, %v355_v52  ;;  %vm420_vm9 = vweird.f32 %v2162_v41  ;;  %v426_v16 = vand.u32 2147483648, %v2162_v41  ;;  %vm407_vm11 = vmor %vm405_vm2, %vm406_vm6 }
  0xc2   :  { %v402_v63 = vsub.f32 1.0, %v401_v54  ;;  %v485_v0 = vmul.f32 %v1724_v32, %v484_v50  ;;  %vm2202_vm10 = vcmp.eq.f32.partialorder %v506_v58, 8.507059e+37  ;;  %v508_v10 = vand.u32 2147483648, %v2150_v30 }
  0xc3   :  { %v1728_v4 = vpop.eup %1727  ;;  %v2194_v6 = vsub.f32 %v377_v13, %v2184_v62  ;;  %620 = vperm.xlu2 %1720, %v2184_v62   ;;  %v2213_v27 = vadd.f32 %v2175_v51, %v2184_v62  ;;  %v441_v38 = vand.u32 2147483648, %v2167_v43  ;;  %vm435_vm1 = vweird.f32 %v2167_v43 }
  0xc4   :  { %v403_v7 = vmul.f32 %v1726_v42, %v402_v63  ;;  %v486_v8 = vadd.f32 %v1724_v32, %v485_v0  ;;  %v498_v5 = vmul.f32 %v1728_v4, %v2150_v30  ;;  %vm503_vm12 = vweird.f32 %v1728_v4 }
  0xc5   :  { %v1730_v18 = vpop.eup %1729  ;;  %v2209_v23 = vadd.f32 %v2132_v60, %v2194_v6  ;;  %v509_v61 = vor.u32 1.1754944e-38, %v508_v10  ;;  %vm504_vm15 = vmor %vm502_vm7, %vm503_vm12  ;;  %v439_v46 = vand.u32 2147483647, %v2167_v43  ;;  %v427_v30 = vor.u32 1.1754944e-38, %v426_v16 }
  0xc6   :  { %v404_v35 = vadd.f32 %v1726_v42, %v403_v7  ;;  %v490_v36 = vsel %vm489_vm8, %v1724_v32, %v486_v8  ;;  %v416_v53 = vmul.f32 %v1730_v18, %v2162_v41  ;;  %v499_v59 = vsub.f32 1.0, %v498_v5 }
  0xc7   :  { %v1732_v40 = vpop.eup %1731  ;;  %v495_v49 = vsel %vm2170_vm3, %v494_v47, %v490_v36  ;;  %1733 = vrcp.f32 %v2209_v23  ;;  %vm421_vm13 = vweird.f32 %v1730_v18  ;;  %v393_v50 = vsub.f32 %v2116_v19, %v2139_v21 }
  0xc8   :  { %v408_v1 = vsel %vm407_vm11, %v1726_v42, %v404_v35  ;;  %v496_v11 = vmul.f32 %v495_v49, %v474_v33  ;;  %v431_v12 = vmul.f32 %v1732_v40, %v2167_v43  ;;  %v417_v17 = vsub.f32 1.0, %v416_v53  ;;  %vm422_vm2 = vmor %vm420_vm9, %vm421_vm13  ;;  %v1702_v35 = vld [vmem:[#allocation7 + $0x2c] sm:$0xf0] }
  0xc9   :  { %v413_v13 = vsel %vm2179_vm4, %v412_v57, %v408_v1  ;;  %v500_v20 = vmul.f32 %v1728_v4, %v499_v59  ;;  %1735 = vrcp.f32 %v2213_v27  ;;  %vm436_vm14 = vweird.f32 %v1732_v40  ;;  %v1701_v59 = vld [vmem:[#allocation7 + $0x14] sm:$0xf] }
  0xca   :  { %v414_v22 = vmul.f32 %v413_v13, %v392_v28  ;;  %v432_v25 = vsub.f32 1.0, %v431_v12  ;;  %v542_v26 = vsub.f32 1.0, %v496_v11  ;;  %v418_v29 = vmul.f32 %v1730_v18, %v417_v17  ;;  %vm437_vm4 = vmor %vm435_vm1, %vm436_vm14  ;;  %v1653_v1 = vld [vmem:[#allocation7 + $0x30] sm:$0xf0] }
  0xcb   :  { %v501_v32 = vadd.f32 %v1728_v4, %v500_v20  ;;  %1737 = vrcp.f32 %v2191_v3  ;;  %vm425_vm3 = vcmp.eq.f32.partialorder %v424_v15, 8.507059e+37  ;;  %v442_v56 = vor.u32 1.1754944e-38, %v441_v38 }
  0xcc   :  { %v460_v33 = vsub.f32 1.0, %v414_v22  ;;  %v433_v37 = vmul.f32 %v1732_v40, %v432_v25  ;;  %v419_v39 = vadd.f32 %v1730_v18, %v418_v29  ;;  %v394_v58 = vsub.f32 %v2132_v60, %v2141_v24 }
  0xcd   :  { %v505_v42 = vsel %vm504_vm15, %v1728_v4, %v501_v32  ;;  %v1734_v28 = vpop.eup %1733  ;;  %vm440_vm5 = vcmp.eq.f32.partialorder %v439_v46, 8.507059e+37  ;;  %vm517_vm6 = vweird.f32 %v2191_v3  ;;  %v523_v4 = vand.u32 2147483648, %v2191_v3 }
  0xce   :  { %v2236_v44 = vadd.f32 %v542_v26, %v460_v33  ;;  %v510_v45 = vsel %vm2202_vm10, %v509_v61, %v505_v42  ;;  %v434_v47 = vadd.f32 %v1732_v40, %v433_v37  ;;  %v423_v52 = vsel %vm422_vm2, %v1730_v18, %v419_v39  ;;  %v1651_v18 = vld [vmem:[#allocation7 + $0x10] sm:$0xf] }
  0xcf   :  { %v511_v54 = vmul.f32 %v510_v45, %v475_v2  ;;  %v2246_v43 = vpop.eup %1735  ;;  %v428_v41 = vsel %vm425_vm3, %v427_v30, %v423_v52  ;;  %v446_v57 = vmul.f32 %v1734_v28, %v2209_v23  ;;  %v521_v2 = vand.u32 2147483647, %v2191_v3 }
  0xd0   :  { %552 = vrot.lane.b32.xlu2 %v2236_v44, %s1875_s0  ;;  %v438_v55 = vsel %vm437_vm4, %v1732_v40, %v434_v47  ;;  %v429_v21 = vmul.f32 %v428_v41, %v393_v50  ;;  %v454_v5 = vand.u32 2147483647, %v2209_v23  ;;  %v395_v24 = vsub.f32 %v2132_v60, %v2184_v62 }
  0xd1   :  { %v1738_v63 = vpop.eup %1737  ;;  %v443_v0 = vsel %vm440_vm5, %v442_v56, %v438_v55  ;;  %v447_v7 = vsub.f32 1.0, %v446_v57  ;;  %v543_v15 = vsub.f32 1.0, %v511_v54  ;;  %vm451_vm7 = vweird.f32 %v1734_v28 }
  0xd2   :  { %v461_v8 = vsub.f32 1.0, %v429_v21  ;;  %v513_v16 = vmul.f32 %v1738_v63, %v2191_v3  ;;  %v456_v10 = vand.u32 2147483648, %v2209_v23  ;;  %v444_v40 = vmul.f32 %v443_v0, %v394_v58  ;;  %v656_v56 = vpop.f32.mrf.mxu1 }
  0xd3   :  { %v448_v9 = vmul.f32 %v1734_v28, %v447_v7  ;;  %v528_v53 = vmul.f32 %v2246_v43, %v2213_v27  ;;  %vm518_vm8 = vweird.f32 %v1738_v63  ;;  %vm450_vm9 = vweird.f32 %v2209_v23 }
  0xd4   :  { %v2261_v36 = vadd.f32 %v543_v15, %v461_v8  ;;  %v514_v49 = vsub.f32 1.0, %v513_v16  ;;  %vm455_vm10 = vcmp.eq.f32.partialorder %v454_v5, 8.507059e+37  ;;  %vm452_vm11 = vmor %vm450_vm9, %vm451_vm7  ;;  %v457_v12 = vor.u32 1.1754944e-38, %v456_v10 }
  0xd5   :  { %v449_v11 = vadd.f32 %v1734_v28, %v448_v9  ;;  %v529_v13 = vsub.f32 1.0, %v528_v53  ;;  %vm533_vm12 = vweird.f32 %v2246_v43  ;;  %v538_v20 = vand.u32 2147483648, %v2213_v27  ;;  %vm519_vm13 = vmor %vm517_vm6, %vm518_vm8 }
  0xd6   :  { %861 = vperm.xlu0 %1721, %v2261_v36   ;;  %556 = vrot.lane.b32.xlu1 %v2261_v36, %s1875_s0  ;;  %v515_v62 = vmul.f32 %v1738_v63, %v514_v49  ;;  %v1652_v61 = vor.u32 %v1702_v35, %v1651_v18  ;;  %v1656_v22 = vor.u32 %v1701_v59, %v1653_v1  ;;  %v536_v29 = vand.u32 2147483647, %v2213_v27 }
  0xd7   :  { %v453_v17 = vsel %vm452_vm11, %v1734_v28, %v449_v11  ;;  %v530_v26 = vmul.f32 %v2246_v43, %v529_v13  ;;  %v476_v32 = vsub.f32 %v2175_v51, %v2156_v34  ;;  %vm522_vm14 = vcmp.eq.f32.partialorder %v521_v2, 8.507059e+37  ;;  %v684_v58 = vpop.f32.mrf.mxu3 }
  0xd8   :  { %v516_v25 = vadd.f32 %v1738_v63, %v515_v62  ;;  %v458_v23 = vsel %vm455_vm10, %v457_v12, %v453_v17  ;;  %v524_v33 = vor.u32 1.1754944e-38, %v523_v4  ;;  %959 = vmatmul.bf16.vlgmr.msra.gmra.mxu2 %v1652_v61  ;;  %973 = vmatmul.bf16.vlgmr.msra.gmra.mxu3 %v1656_v22  ;;  %vm532_vm15 = vweird.f32 %v2213_v27 }
  0xd9   :  { %v459_v38 = vmul.f32 %v458_v23, %v395_v24  ;;  %v531_v39 = vadd.f32 %v2246_v43, %v530_v26  ;;  %931 = vmatmul.bf16.vlgmr.msra.gmra.mxu0 %v1652_v61  ;;  %945 = vmatmul.bf16.vlgmr.msra.gmra.mxu1 %v1656_v22  ;;  %v462_v42 = vsub.f32 1.0, %v444_v40  ;;  %vm534_vm1 = vmor %vm532_vm15, %vm533_vm12  ;;  %v539_v34 = vor.u32 1.1754944e-38, %v538_v20 }
  0xda   :  { %v520_v37 = vsel %vm519_vm13, %v1738_v63, %v516_v25  ;;  %v477_v28 = vsub.f32 %v2175_v51, %v2194_v6  ;;  %vm537_vm2 = vcmp.eq.f32.partialorder %v536_v29, 8.507059e+37  ;;  %v642_v6 = vpop.f32.mrf.mxu0  ;;  %v689_v55 = vadd.s32 257, %v2114_v14  ;;  %v658_v40 = vpop.f32.mrf.mxu1 }
  0xdb   :  { %v525_v46 = vsel %vm522_vm14, %v524_v33, %v520_v37  ;;  %v535_v30 = vsel %vm534_vm1, %v2246_v43, %v531_v39  ;;  %v463_v50 = vsub.f32 1.0, %v459_v38  ;;  %v670_v43 = vpop.f32.mrf.mxu2  ;;  %v2297_v57 = vadd.s32 257, %v2120_v31 }
  0xdc   :  { %v526_v3 = vmul.f32 %v525_v46, %v476_v32  ;;  %v540_v45 = vsel %vm537_vm2, %v539_v34, %v535_v30  ;;  %v693_v2 = vcvt.s32.f32 %v689_v55 }
  0xdd   :  { %v541_v52 = vmul.f32 %v540_v45, %v477_v28  ;;  %v694_v4 = vcvt.s32.f32 %v2297_v57 }
  0xde   :  { %v544_v47 = vsub.f32 1.0, %v526_v3 }
  0xdf   :  { %v545_v54 = vsub.f32 1.0, %v541_v52  ;;  %v686_v11 = vpop.f32.mrf.mxu3 }
  0xe0   :  { %v2286_v27 = vadd.f32 %v544_v47, %v462_v42 }
  0xe1   :  { %v2290_v41 = vadd.f32 %v545_v54, %v463_v50 }
  0xe2   :  { %554 = vrot.lane.b32.xlu0 %v2286_v27, %s1875_s0  ;;  %v644_v24 = vpop.f32.mrf.mxu0 }
  0xe3   :  { %558 = vrot.lane.b32.xlu2 %v2290_v41, %s1875_s0  ;;  %v672_v10 = vpop.f32.mrf.mxu2 }
  0xea   :  { %866 = vperm.xlu0 %1721, %v2290_v41  }
 0x115   :  { %v616_v21 = vpop.permute.xlu2 %615 }
 0x116   :  { %v643_v63 = vadd.f32 %v642_v6, %v616_v21  ;;  %v671_v0 = vadd.f32 %v670_v43, %v616_v21 }
 0x118   :  { %v2300_v7 = vadd.f32 %v684_v58, %v671_v0  ;;  %v2302_v8 = vadd.f32 %v656_v56, %v643_v63 }
 0x11a   :  { %v2306_v15 = vadd.f32 %v2300_v7, %v2124_v48  ;;  %v2309_v16 = vsub.f32 %v693_v2, %v2302_v8  ;;  %v2313_v5 = vadd.f32 %v2302_v8, %v2124_v48  ;;  %905 = vperm.xlu1 %1722, %v2300_v7   ;;  %v2319_v9 = vsub.f32 %v694_v4, %v2300_v7 }
 0x11b   :  { %v699_v1 = vsub.f32 %v2116_v19, %v2302_v8  ;;  %v700_v22 = vsub.f32 %v2116_v19, %v2300_v7 }
 0x11c   :  { %1739 = vrcp.f32 %v2306_v15  ;;  %v2324_v18 = vadd.f32 %v2309_v16, %v2116_v19  ;;  %v2329_v49 = vadd.f32 %v2319_v9, %v2116_v19  ;;  %v788_v62 = vand.u32 2147483647, %v2313_v5 }
 0x11d   :  { %1741 = vrcp.f32 %v2313_v5  ;;  %v621_v35 = vpop.permute.xlu2 %620  ;;  %v790_v17 = vand.u32 2147483648, %v2313_v5  ;;  %v771_v26 = vsub.f32 %v2124_v48, %v2309_v16  ;;  %vm784_vm4 = vweird.f32 %v2313_v5 }
 0x11e   :  { %1743 = vrcp.f32 %v2324_v18  ;;  %v645_v53 = vadd.f32 %v644_v24, %v621_v35  ;;  %v673_v59 = vadd.f32 %v672_v10, %v621_v35  ;;  %v716_v20 = vand.u32 2147483647, %v2324_v18 }
 0x11f   :  { %1745 = vrcp.f32 %v2329_v49  ;;  %v718_v61 = vand.u32 2147483648, %v2324_v18  ;;  %v733_v25 = vand.u32 2147483648, %v2329_v49  ;;  %vm712_vm3 = vweird.f32 %v2324_v18 }
 0x120   :  { %v2335_v12 = vadd.f32 %v686_v11, %v673_v59  ;;  %v2337_v13 = vadd.f32 %v658_v40, %v645_v53  ;;  %v731_v38 = vand.u32 2147483647, %v2329_v49  ;;  %vm2373_vm5 = vcmp.eq.f32.partialorder %v788_v62, 8.507059e+37 }
 0x121   :  { %v791_v28 = vor.u32 1.1754944e-38, %v790_v17  ;;  %vm2379_vm6 = vcmp.eq.f32.partialorder %v716_v20, 8.507059e+37  ;;  %v719_v47 = vor.u32 1.1754944e-38, %v718_v61  ;;  %vm727_vm7 = vweird.f32 %v2329_v49 }
 0x122   :  { %v2346_v23 = vpop.eup %1739  ;;  %v2352_v29 = vadd.f32 %v2335_v12, %v2175_v51  ;;  %v2355_v32 = vsub.f32 %v693_v2, %v2337_v13  ;;  %v2359_v33 = vadd.f32 %v2337_v13, %v2175_v51  ;;  %910 = vperm.xlu2 %1720, %v2335_v12   ;;  %v734_v50 = vor.u32 1.1754944e-38, %v733_v25 }
 0x123   :  { %v1742_v37 = vpop.eup %1741  ;;  %v795_v39 = vmul.f32 %v2346_v23, %v2306_v15  ;;  %v772_v6 = vsub.f32 %v2124_v48, %v2319_v9  ;;  %vm2388_vm9 = vcmp.eq.f32.partialorder %v731_v38, 8.507059e+37  ;;  %vm800_vm10 = vweird.f32 %v2346_v23 }
 0x124   :  { %v1744_v42 = vpop.eup %1743  ;;  %v780_v46 = vmul.f32 %v1742_v37, %v2313_v5  ;;  %1747 = vrcp.f32 %v2352_v29  ;;  %v2371_v34 = vadd.f32 %v2355_v32, %v2132_v60  ;;  %vm785_vm8 = vweird.f32 %v1742_v37 }
 0x125   :  { %1749 = vrcp.f32 %v2359_v33  ;;  %v708_v30 = vmul.f32 %v1744_v42, %v2324_v18  ;;  %v1746_v52 = vpop.eup %1745  ;;  %v796_v43 = vsub.f32 1.0, %v795_v39  ;;  %v803_v0 = vand.u32 2147483647, %v2306_v15  ;;  %vm2401_vm13 = vmor %vm784_vm4, %vm785_vm8 }
 0x126   :  { %v781_v54 = vsub.f32 1.0, %v780_v46  ;;  %1751 = vrcp.f32 %v2371_v34  ;;  %v723_v56 = vmul.f32 %v1746_v52, %v2329_v49  ;;  %v805_v2 = vand.u32 2147483648, %v2306_v15 }
 0x127   :  { %v709_v55 = vsub.f32 1.0, %v708_v30  ;;  %v797_v63 = vmul.f32 %v2346_v23, %v796_v43  ;;  %vm713_vm11 = vweird.f32 %v1744_v42  ;;  %vm799_vm12 = vweird.f32 %v2306_v15 }
 0x128   :  { %v782_v21 = vmul.f32 %v1742_v37, %v781_v54  ;;  %v724_v9 = vsub.f32 1.0, %v723_v56  ;;  %vm728_vm14 = vweird.f32 %v1746_v52  ;;  %v746_v59 = vand.u32 2147483647, %v2371_v34  ;;  %vm801_vm15 = vmor %vm799_vm12, %vm800_vm10 }
 0x129   :  { %v710_v24 = vmul.f32 %v1744_v42, %v709_v55  ;;  %v798_v53 = vadd.f32 %v2346_v23, %v797_v63  ;;  %vm804_vm1 = vcmp.eq.f32.partialorder %v803_v0, 8.507059e+37  ;;  %v806_v15 = vor.u32 1.1754944e-38, %v805_v2  ;;  %vm714_vm2 = vmor %vm712_vm3, %vm713_vm11 }
 0x12a   :  { %v2397_v10 = vpop.eup %1747  ;;  %v783_v35 = vadd.f32 %v1742_v37, %v782_v21  ;;  %v725_v17 = vmul.f32 %v1746_v52, %v724_v9  ;;  %v748_v38 = vand.u32 2147483648, %v2371_v34  ;;  %vm729_vm3 = vmor %vm727_vm7, %vm728_vm14  ;;  %vm814_vm4 = vweird.f32 %v2359_v33 }
 0x12b   :  { %v1750_v11 = vpop.eup %1749  ;;  %v711_v62 = vadd.f32 %v1744_v42, %v710_v24  ;;  %v802_v25 = vsel %vm801_vm15, %v2346_v23, %v798_v53  ;;  %v818_v8 = vand.u32 2147483647, %v2359_v33  ;;  %v773_v7 = vsub.f32 %v2175_v51, %v2355_v32 }
 0x12c   :  { %v1752_v20 = vpop.eup %1751  ;;  %v810_v5 = vmul.f32 %v1750_v11, %v2359_v33  ;;  %v787_v61 = vsel %vm2401_vm13, %v1742_v37, %v783_v35  ;;  %v726_v30 = vadd.f32 %v1746_v52, %v725_v17  ;;  %v807_v54 = vsel %vm804_vm1, %v806_v15, %v802_v25  ;;  %v2465_v35 = vpop.permute.xlu0 %571 }
 0x12d   :  { %v715_v39 = vsel %vm714_vm2, %v1744_v42, %v711_v62  ;;  %v792_v46 = vsel %vm2373_vm5, %v791_v28, %v787_v61  ;;  %v808_v23 = vmul.f32 %v807_v54, %v772_v6  ;;  %v738_v3 = vmul.f32 %v1752_v20, %v2371_v34 }
 0x12e   :  { %v811_v43 = vsub.f32 1.0, %v810_v5  ;;  %v720_v55 = vsel %vm2379_vm6, %v719_v47, %v715_v39  ;;  %v793_v18 = vmul.f32 %v792_v46, %v771_v26  ;;  %v730_v42 = vsel %vm729_vm3, %v1746_v52, %v726_v30 }
 0x12f   :  { %v721_v37 = vmul.f32 %v720_v55, %v699_v1  ;;  %v735_v45 = vsel %vm2388_vm9, %v734_v50, %v730_v42  ;;  %v840_v16 = vsub.f32 1.0, %v808_v23  ;;  %vm743_vm5 = vweird.f32 %v1752_v20  ;;  %v1659_v55 = vld [vmem:[#allocation7 + $0x18] sm:$0xf] }
 0x130   :  { %v839_v28 = vsub.f32 1.0, %v793_v18  ;;  %v736_v49 = vmul.f32 %v735_v45, %v700_v22  ;;  %v739_v47 = vsub.f32 1.0, %v738_v3  ;;  %v812_v6 = vmul.f32 %v1750_v11, %v811_v43  ;;  %v1704_v18 = vld [vmem:[#allocation7 + $0x34] sm:$0xf0] }
 0x131   :  { %v767_v26 = vsub.f32 1.0, %v721_v37  ;;  %vm815_vm6 = vweird.f32 %v1750_v11  ;;  %v820_v1 = vand.u32 2147483648, %v2359_v33  ;;  %v2442_v52 = vsub.f32 %v694_v4, %v2335_v12 }
 0x132   :  { %v768_v56 = vsub.f32 1.0, %v736_v49  ;;  %v740_v58 = vmul.f32 %v1752_v20, %v739_v47  ;;  %v813_v21 = vadd.f32 %v1750_v11, %v812_v6  ;;  %vm742_vm7 = vweird.f32 %v2371_v34  ;;  %vm816_vm8 = vmor %vm814_vm4, %vm815_vm6 }
 0x133   :  { %v2444_v50 = vadd.f32 %v839_v28, %v767_v26  ;;  %v821_v22 = vor.u32 1.1754944e-38, %v820_v1  ;;  %v706_v63 = vadd.f32 %v2442_v52, %v2132_v60  ;;  %vm819_vm9 = vcmp.eq.f32.partialorder %v818_v8, 8.507059e+37  ;;  %vm744_vm10 = vmor %vm742_vm7, %vm743_vm5 }
 0x134   :  { %v2455_v57 = vadd.f32 %v840_v16, %v768_v56  ;;  %v741_v4 = vadd.f32 %v1752_v20, %v740_v58  ;;  %v817_v0 = vsel %vm816_vm8, %v1750_v11, %v813_v21  ;;  %v701_v32 = vsub.f32 %v2132_v60, %v2337_v13  ;;  %v577_v23 = vpop.permute.xlu0 %576  ;;  %v553_v56 = vpop.permute.xlu2 %552  ;;  %v123_v58 = vld [vmem:[#allocation5 + $0x40] sm:$0xff]  ;;  %v124_v21 = vld [vmem:[#allocation5 + $0x48] sm:$0xff] }
 0x135   :  { %847 = vrot.lane.b32.xlu0 %v2444_v50, %s1875_s0  ;;  %v749_v34 = vor.u32 1.1754944e-38, %v748_v38  ;;  %v822_v33 = vsel %vm819_vm9, %v821_v22, %v817_v0  ;;  %1753 = vrcp.f32 %v706_v63  ;;  %vm747_vm11 = vcmp.eq.f32.partialorder %v746_v59, 8.507059e+37 }
 0x136   :  { %1151 = vperm.xlu1 %1722, %v2455_v57   ;;  %851 = vrot.lane.b32.xlu2 %v2455_v57, %s1875_s0  ;;  %v745_v2 = vsel %vm744_vm10, %v1752_v20, %v741_v4  ;;  %v823_v24 = vmul.f32 %v822_v33, %v773_v7  ;;  %v825_v9 = vmul.f32 %v2397_v10, %v2352_v29  ;;  %vm830_vm12 = vweird.f32 %v2397_v10  ;;  %v121_v7 = vld [vmem:[#allocation5] sm:$0xff] }
 0x137   :  { %v750_v40 = vsel %vm747_vm11, %v749_v34, %v745_v2  ;;  %vm829_vm13 = vweird.f32 %v2352_v29  ;;  %v835_v59 = vand.u32 2147483648, %v2352_v29  ;;  %v833_v25 = vand.u32 2147483647, %v2352_v29 }
 0x138   :  { %v751_v13 = vmul.f32 %v750_v40, %v701_v32  ;;  %v826_v53 = vsub.f32 1.0, %v825_v9  ;;  %v841_v62 = vsub.f32 1.0, %v823_v24  ;;  %vm831_vm14 = vmor %vm829_vm13, %vm830_vm12  ;;  %v761_v46 = vand.u32 2147483647, %v706_v63 }
 0x139   :  { %v763_v30 = vand.u32 2147483648, %v706_v63  ;;  %v836_v54 = vor.u32 1.1754944e-38, %v835_v59  ;;  %vm834_vm1 = vcmp.eq.f32.partialorder %v833_v25, 8.507059e+37  ;;  %v1660_v42 = vor.u32 %v1704_v18, %v1659_v55 }
 0x13a   :  { %v769_v11 = vsub.f32 1.0, %v751_v13  ;;  %v827_v17 = vmul.f32 %v2397_v10, %v826_v53  ;;  %vm757_vm2 = vweird.f32 %v706_v63  ;;  %v774_v29 = vsub.f32 %v2175_v51, %v2442_v52 }
 0x13b   :  { %v1754_v15 = vpop.eup %1753  ;;  %v764_v28 = vor.u32 1.1754944e-38, %v763_v30  ;;  %1249 = vmatmul.bf16.vlgmr.msrb.gmra.mxu2 %v1660_v42  ;;  %1221 = vmatmul.bf16.vlgmr.msrb.gmra.mxu0 %v1660_v42  ;;  %vm762_vm4 = vcmp.eq.f32.partialorder %v761_v46, 8.507059e+37  ;;  %vm560_vm5 = vcmp.lt.s32.totalorder %v2114_v14, 1  ;;  %vm2923_vm6 = vcmp.ge.s32.totalorder %v2114_v14, 1 }
 0x13c   :  { %v2471_v20 = vadd.f32 %v841_v62, %v769_v11  ;;  %v753_v5 = vmul.f32 %v1754_v15, %v706_v63  ;;  %v828_v61 = vadd.f32 %v2397_v10, %v827_v17  ;;  %vm758_vm15 = vweird.f32 %v1754_v15 }
 0x13d   :  { %vm759_vm3 = vmor %vm757_vm2, %vm758_vm15  ;;  %v127_v63 = vsub.f32 0.0, %v123_v58  ;;  %v128_v4 = vsub.f32 0.0, %v124_v21  ;;  %v125_v32 = vsub.f32 0.0, %v121_v7  ;;  %v559_v34 = vpop.permute.xlu2 %558 }
 0x13e   :  { %849 = vrot.lane.b32.xlu0 %v2471_v20, %s1875_s0  ;;  %v754_v38 = vsub.f32 1.0, %v753_v5  ;;  %v832_v39 = vsel %vm831_vm14, %v2397_v10, %v828_v61  ;;  %v702_v10 = vsub.f32 %v2132_v60, %v2335_v12  ;;  %v122_v12 = vld [vmem:[#allocation5 + $0x8] sm:$0xff] }
 0x13f   :  { %v837_v37 = vsel %vm834_vm1, %v836_v54, %v832_v39  ;;  %v126_v0 = vsub.f32 0.0, %v122_v12  ;;  %v131_v13 = vmax.f32 %v127_v63, 0.0  ;;  %v132_v62 = vmax.f32 %v128_v4, 0.0  ;;  %v1661_v39 = vld [vmem:[#allocation7 + $0x38] sm:$0xf0] }
 0x140   :  { %v755_v43 = vmul.f32 %v1754_v15, %v754_v38  ;;  %v838_v16 = vmul.f32 %v837_v37, %v774_v29  ;;  %v129_v5 = vmax.f32 %v125_v32, 0.0  ;;  %v1703_v38 = vld [vmem:[#allocation7 + $0x1c] sm:$0xf] }
 0x141   :  { %v130_v17 = vmax.f32 %v126_v0, 0.0  ;;  %v1664_v54 = vor.u32 %v1703_v38, %v1661_v39 }
 0x142   :  { %v756_v3 = vadd.f32 %v1754_v15, %v755_v43  ;;  %v842_v6 = vsub.f32 1.0, %v838_v16 }
 0x143   :  { %1263 = vmatmul.bf16.vlgmr.msrb.gmra.mxu3 %v1664_v54  ;;  %1235 = vmatmul.bf16.vlgmr.msrb.gmra.mxu1 %v1664_v54 }
 0x144   :  { %v760_v45 = vsel %vm759_vm3, %v1754_v15, %v756_v3 }
 0x145   :  { %v765_v26 = vsel %vm762_vm4, %v764_v28, %v760_v45 }
 0x146   :  { %v766_v49 = vmul.f32 %v765_v26, %v702_v10 }
 0x148   :  { %v770_v47 = vsub.f32 1.0, %v766_v49  ;;  %v2482_v8 = vpop.permute.xlu0 %861  ;;  %v557_v52 = vpop.permute.xlu1 %556 }
 0x149   :  { %v563_v22 = vsel %vm560_vm5, %v557_v52, %v553_v56  ;;  %v561_v33 = vsel %vm560_vm5, %v553_v56, %v557_v52 }
 0x14a   :  { %v2484_v1 = vadd.f32 %v842_v6, %v770_v47  ;;  %v579_v2 = vsel %vm2923_vm6, %v563_v22, %v2465_v35  ;;  %v584_v59 = vsub.f32 %v2261_v36, %v561_v33 }
 0x14b   :  { %v583_v15 = vsub.f32 %v2236_v44, %v579_v2 }
 0x14c   :  { %1156 = vperm.xlu0 %1721, %v2484_v1   ;;  %v588_v30 = vmul.f32 %v584_v59, %v130_v17 }
 0x14d   :  { %v587_v46 = vmul.f32 %v583_v15, %v129_v5 }
 0x154   :  { %v555_v24 = vpop.permute.xlu0 %554 }
 0x155   :  { %v562_v9 = vsel %vm560_vm5, %v555_v24, %v559_v34  ;;  %v564_v40 = vsel %vm560_vm5, %v559_v34, %v555_v24 }
 0x156   :  { %v581_v53 = vsel %vm2923_vm6, %v564_v40, %v577_v23  ;;  %v586_v11 = vsub.f32 %v2290_v41, %v562_v9  ;;  %v591_v41 = vadd.f32 %v588_v30, %v587_v46  ;;  %v932_v55 = vpop.f32.mrf.mxu0  ;;  %v946_v18 = vpop.f32.mrf.mxu1  ;;  %v980_v23 = vadd.s32 513, %v2120_v31 }
 0x157   :  { %v585_v35 = vsub.f32 %v2286_v27, %v581_v53  ;;  %v979_v27 = vadd.s32 513, %v2114_v14 }
 0x158   :  { %v590_v25 = vmul.f32 %v586_v11, %v132_v62  ;;  %v984_v26 = vcvt.s32.f32 %v980_v23 }
 0x159   :  { %v589_v61 = vmul.f32 %v585_v35, %v131_v13  ;;  %v983_v16 = vcvt.s32.f32 %v979_v27 }
 0x15b   :  { %v594_v43 = vadd.f32 %v590_v25, %v589_v61  ;;  %v960_v44 = vpop.f32.mrf.mxu2  ;;  %v974_v36 = vpop.f32.mrf.mxu3 }
 0x15e   :  { %v934_v37 = vpop.f32.mrf.mxu0  ;;  %v948_v3 = vpop.f32.mrf.mxu1 }
 0x15f   :  { %595 = vadd.xlane.f32.xlu2 %v594_v43 }
 0x160   :  { %592 = vadd.xlane.f32.xlu1 %v591_v41 }
 0x163   :  { %v962_v42 = vpop.f32.mrf.mxu2  ;;  %v976_v28 = vpop.f32.mrf.mxu3 }
 0x179   :  { %853 = vrot.lane.b32.xlu1 %v2484_v1, %s1875_s0 }
 0x17c   :  { %v911_v29 = vpop.permute.xlu2 %910 }
 0x17d   :  { %v935_v10 = vadd.f32 %v934_v37, %v911_v29  ;;  %v963_v45 = vadd.f32 %v962_v42, %v911_v29 }
 0x17f   :  { %v2510_v49 = vadd.f32 %v948_v3, %v935_v10  ;;  %v2512_v47 = vadd.f32 %v976_v28, %v963_v45 }
 0x181   :  { %v2515_v6 = vsub.f32 %v983_v16, %v2510_v49  ;;  %v988_v56 = vsub.f32 %v984_v26, %v2512_v47  ;;  %v1068_v52 = vadd.f32 %v2512_v47, %v2175_v51  ;;  %v2528_v12 = vadd.f32 %v2510_v49, %v2175_v51 }
 0x182   :  { %v992_v27 = vsub.f32 %v2132_v60, %v2512_v47 }
 0x183   :  { %v2522_v58 = vadd.f32 %v2515_v6, %v2132_v60  ;;  %v996_v21 = vadd.f32 %v988_v56, %v2132_v60  ;;  %1755 = vrcp.f32 %v1068_v52  ;;  %v1064_v32 = vsub.f32 %v2175_v51, %v988_v56 }
 0x184   :  { %v1123_v34 = vand.u32 2147483647, %v1068_v52  ;;  %v1125_v9 = vand.u32 2147483648, %v1068_v52  ;;  %vm1119_vm8 = vweird.f32 %v1068_v52 }
 0x185   :  { %1757 = vrcp.f32 %v2522_v58  ;;  %vm1047_vm7 = vweird.f32 %v996_v21  ;;  %v1051_v40 = vand.u32 2147483647, %v996_v21  ;;  %v1053_v59 = vand.u32 2147483648, %v996_v21 }
 0x186   :  { %1759 = vrcp.f32 %v996_v21  ;;  %vm2542_vm10 = vcmp.eq.f32.partialorder %v1123_v34, 8.507059e+37  ;;  %v1126_v39 = vor.u32 1.1754944e-38, %v1125_v9 }
 0x187   :  { %1761 = vrcp.f32 %v2528_v12  ;;  %v1054_v23 = vor.u32 1.1754944e-38, %v1053_v59  ;;  %vm1052_vm14 = vcmp.eq.f32.partialorder %v1051_v40, 8.507059e+37 }
 0x189   :  { %v1756_v7 = vpop.eup %1755 }
 0x18a   :  { %v1115_v63 = vmul.f32 %v1756_v7, %v1068_v52  ;;  %vm1120_vm9 = vweird.f32 %v1756_v7 }
 0x18b   :  { %v2531_v22 = vpop.eup %1757  ;;  %vm1121_vm12 = vmor %vm1119_vm8, %vm1120_vm9 }
 0x18c   :  { %v1760_v4 = vpop.eup %1759  ;;  %v906_v0 = vpop.permute.xlu1 %905  ;;  %v1116_v13 = vsub.f32 1.0, %v1115_v63  ;;  %v1028_v17 = vmul.f32 %v2531_v22, %v2522_v58 }
 0x18d   :  { %v933_v33 = vadd.f32 %v932_v55, %v906_v0  ;;  %v961_v2 = vadd.f32 %v960_v44, %v906_v0  ;;  %v1043_v24 = vmul.f32 %v1760_v4, %v996_v21  ;;  %v2540_v15 = vpop.eup %1761  ;;  %vm1048_vm11 = vweird.f32 %v1760_v4 }
 0x18e   :  { %v1117_v35 = vmul.f32 %v1756_v7, %v1116_v13  ;;  %v2563_v43 = vmul.f32 %v2540_v15, %v2528_v12  ;;  %v1029_v55 = vsub.f32 1.0, %v1028_v17  ;;  %vm1049_vm13 = vmor %vm1047_vm7, %vm1048_vm11 }
 0x18f   :  { %v2534_v53 = vadd.f32 %v946_v18, %v933_v33  ;;  %v2536_v11 = vadd.f32 %v974_v36, %v961_v2  ;;  %v1044_v62 = vsub.f32 1.0, %v1043_v24 }
 0x190   :  { %v1118_v30 = vadd.f32 %v1756_v7, %v1117_v35  ;;  %v1101_v10 = vsub.f32 1.0, %v2563_v43 }
 0x191   :  { %v2547_v61 = vsub.f32 %v983_v16, %v2534_v53  ;;  %v2551_v25 = vadd.f32 %v2534_v53, %v2124_v48  ;;  %v2555_v38 = vadd.f32 %v2536_v11, %v2124_v48  ;;  %1195 = vperm.xlu0 %1721, %v2536_v11   ;;  %v1045_v46 = vmul.f32 %v1760_v4, %v1044_v62 }
 0x192   :  { %v2559_v54 = vsub.f32 %v984_v26, %v2536_v11  ;;  %v1122_v18 = vsel %vm1121_vm12, %v1756_v7, %v1118_v30  ;;  %v2587_v26 = vmul.f32 %v2531_v22, %v1029_v55  ;;  %v989_v52 = vsub.f32 %v2116_v19, %v2534_v53 }
 0x193   :  { %v2567_v41 = vadd.f32 %v2547_v61, %v2116_v19  ;;  %1763 = vrcp.f32 %v2551_v25  ;;  %v1046_v44 = vadd.f32 %v1760_v4, %v1045_v46  ;;  %v1127_v37 = vsel %vm2542_vm10, %v1126_v39, %v1122_v18 }
 0x194   :  { %1765 = vrcp.f32 %v2555_v38  ;;  %v2574_v36 = vadd.f32 %v2559_v54, %v2116_v19  ;;  %v1128_v3 = vmul.f32 %v1127_v37, %v1064_v32  ;;  %v1093_v28 = vand.u32 2147483647, %v2555_v38 }
 0x195   :  { %1767 = vrcp.f32 %v2567_v41  ;;  %v1050_v42 = vsel %vm1049_vm13, %v1760_v4, %v1046_v44  ;;  %v990_v21 = vsub.f32 %v2116_v19, %v2536_v11  ;;  %vm1089_vm15 = vweird.f32 %v2555_v38 }
 0x196   :  { %1769 = vrcp.f32 %v2574_v36  ;;  %v1055_v29 = vsel %vm1052_vm14, %v1054_v23, %v1050_v42  ;;  %v1023_v16 = vand.u32 2147483648, %v2574_v36  ;;  %v1095_v7 = vand.u32 2147483648, %v2555_v38 }
 0x197   :  { %v1056_v45 = vmul.f32 %v1055_v29, %v992_v27  ;;  %v1132_v0 = vsub.f32 1.0, %v1128_v3  ;;  %v1062_v32 = vsub.f32 %v2124_v48, %v2559_v54  ;;  %vm1017_vm1 = vweird.f32 %v2574_v36 }
 0x198   :  { %vm2602_vm2 = vcmp.eq.f32.partialorder %v1093_v28, 8.507059e+37  ;;  %vm1002_vm3 = vweird.f32 %v2567_v41  ;;  %v1006_v9 = vand.u32 2147483647, %v2567_v41  ;;  %v1024_v62 = vor.u32 1.1754944e-38, %v1023_v16 }
 0x199   :  { %v1764_v56 = vpop.eup %1763  ;;  %1200 = vperm.xlu0 %1721, %v2512_v47   ;;  %v1060_v4 = vsub.f32 1.0, %v1056_v45  ;;  %v1021_v47 = vand.u32 2147483647, %v2574_v36  ;;  %v1096_v39 = vor.u32 1.1754944e-38, %v1095_v7  ;;  %v1078_v54 = vand.u32 2147483647, %v2551_v25 }
 0x19a   :  { %v1766_v63 = vpop.eup %1765  ;;  %v1070_v34 = vmul.f32 %v1764_v56, %v2551_v25  ;;  %vm1075_vm4 = vweird.f32 %v1764_v56  ;;  %v1080_v55 = vand.u32 2147483648, %v2551_v25  ;;  %v1008_v27 = vand.u32 2147483648, %v2567_v41 }
 0x19b   :  { %v1768_v33 = vpop.eup %1767  ;;  %v1085_v2 = vmul.f32 %v1766_v63, %v2555_v38  ;;  %v2608_v13 = vadd.f32 %v1132_v0, %v1060_v4  ;;  %vm1090_vm7 = vweird.f32 %v1766_v63  ;;  %vm1074_vm9 = vweird.f32 %v2551_v25 }
 0x19c   :  { %v1770_v40 = vpop.eup %1769  ;;  %v998_v17 = vmul.f32 %v1768_v33, %v2567_v41  ;;  %v1071_v59 = vsub.f32 1.0, %v1070_v34  ;;  %vm1003_vm8 = vweird.f32 %v1768_v33  ;;  %vm1076_vm11 = vmor %vm1074_vm9, %vm1075_vm4  ;;  %v1081_v29 = vor.u32 1.1754944e-38, %v1080_v55 }
 0x19d   :  { %v1013_v35 = vmul.f32 %v1770_v40, %v2574_v36  ;;  %v1086_v5 = vsub.f32 1.0, %v1085_v2  ;;  %1446 = vperm.xlu2 %1720, %v2608_v13   ;;  %vm1018_vm10 = vweird.f32 %v1770_v40  ;;  %vm1091_vm12 = vmor %vm1089_vm15, %vm1090_vm7  ;;  %v1061_v45 = vsub.f32 %v2124_v48, %v2547_v61 }
 0x19e   :  { %v999_v46 = vsub.f32 1.0, %v998_v17  ;;  %v1072_v30 = vmul.f32 %v1764_v56, %v1071_v59  ;;  %vm1079_vm13 = vcmp.eq.f32.partialorder %v1078_v54, 8.507059e+37  ;;  %vm1004_vm14 = vmor %vm1002_vm3, %vm1003_vm8  ;;  %v1009_v25 = vor.u32 1.1754944e-38, %v1008_v27  ;;  %v599_v27 = vld [vmem:[#allocation5 + $0x10] sm:$0xff] }
 0x19f   :  { %v1014_v44 = vsub.f32 1.0, %v1013_v35  ;;  %v1087_v18 = vmul.f32 %v1766_v63, %v1086_v5  ;;  %vm1019_vm4 = vmor %vm1017_vm1, %vm1018_vm10  ;;  %vm1007_vm15 = vcmp.eq.f32.partialorder %v1006_v9, 8.507059e+37  ;;  %vm1022_vm7 = vcmp.eq.f32.partialorder %v1021_v47, 8.507059e+37 }
 0x1a0   :  { %v1000_v23 = vmul.f32 %v1768_v33, %v999_v46  ;;  %v1073_v37 = vadd.f32 %v1764_v56, %v1072_v30  ;;  %v1102_v36 = vmul.f32 %v2540_v15, %v1101_v10  ;;  %v1031_v47 = vadd.f32 %v2531_v22, %v2587_v26 }
 0x1a1   :  { %v1015_v42 = vmul.f32 %v1770_v40, %v1014_v44  ;;  %v1088_v3 = vadd.f32 %v1766_v63, %v1087_v18  ;;  %vm1033_vm1 = vweird.f32 %v2531_v22  ;;  %v1038_v53 = vand.u32 2147483648, %v2522_v58 }
 0x1a2   :  { %v1001_v28 = vadd.f32 %v1768_v33, %v1000_v23  ;;  %v1077_v16 = vsel %vm1076_vm11, %v1764_v56, %v1073_v37  ;;  %v1036_v10 = vand.u32 2147483647, %v2522_v58  ;;  %v1103_v11 = vadd.f32 %v2540_v15, %v1102_v36 }
 0x1a3   :  { %v1016_v7 = vadd.f32 %v1770_v40, %v1015_v42  ;;  %v1092_v4 = vsel %vm1091_vm12, %v1766_v63, %v1088_v3  ;;  %v1082_v0 = vsel %vm1079_vm13, %v1081_v29, %v1077_v16  ;;  %vm1105_vm3 = vweird.f32 %v2540_v15 }
 0x1a4   :  { %v1097_v38 = vsel %vm2602_vm2, %v1096_v39, %v1092_v4  ;;  %v1005_v34 = vsel %vm1004_vm14, %v1768_v33, %v1001_v28  ;;  %v1083_v2 = vmul.f32 %v1082_v0, %v1061_v45  ;;  %vm1032_vm2 = vweird.f32 %v2522_v58 }
 0x1a5   :  { %v1020_v61 = vsel %vm1019_vm4, %v1770_v40, %v1016_v7  ;;  %v1098_v56 = vmul.f32 %v1097_v38, %v1062_v32  ;;  %v1010_v17 = vsel %vm1007_vm15, %v1009_v25, %v1005_v34  ;;  %vm1034_vm8 = vmor %vm1032_vm2, %vm1033_vm1  ;;  %v1110_v26 = vand.u32 2147483648, %v2528_v12 }
 0x1a6   :  { %v1025_v63 = vsel %vm1022_vm7, %v1024_v62, %v1020_v61  ;;  %v1011_v41 = vmul.f32 %v1010_v17, %v989_v52  ;;  %v1129_v9 = vsub.f32 1.0, %v1083_v2  ;;  %vm1104_vm9 = vweird.f32 %v2528_v12  ;;  %v602_v2 = vld [vmem:[#allocation5 + $0x58] sm:$0xff]  ;;  %v601_v61 = vld [vmem:[#allocation5 + $0x50] sm:$0xff] }
 0x1a7   :  { %v1026_v24 = vmul.f32 %v1025_v63, %v990_v21  ;;  %v1130_v40 = vsub.f32 1.0, %v1098_v56  ;;  %v1035_v21 = vsel %vm1034_vm8, %v2531_v22, %v1031_v47  ;;  %v1108_v62 = vand.u32 2147483647, %v2528_v12  ;;  %vm1106_vm10 = vmor %vm1104_vm9, %vm1105_vm3 }
 0x1a8   :  { %v1057_v33 = vsub.f32 1.0, %v1011_v41  ;;  %v1039_v58 = vor.u32 1.1754944e-38, %v1038_v53  ;;  %vm1037_vm11 = vcmp.eq.f32.partialorder %v1036_v10, 8.507059e+37  ;;  %v1107_v59 = vsel %vm1106_vm10, %v2540_v15, %v1103_v11  ;;  %v867_v15 = vpop.permute.xlu0 %866  ;;  %v2679_v38 = vpop.permute.xlu1 %1151 }
 0x1a9   :  { %v1058_v32 = vsub.f32 1.0, %v1026_v24  ;;  %v1111_v5 = vor.u32 1.1754944e-38, %v1110_v26  ;;  %v991_v39 = vsub.f32 %v2132_v60, %v2510_v49  ;;  %vm1109_vm12 = vcmp.eq.f32.partialorder %v1108_v62, 8.507059e+37  ;;  %v852_v49 = vpop.permute.xlu2 %851 }
 0x1aa   :  { %v2643_v43 = vadd.f32 %v1129_v9, %v1057_v33  ;;  %v1040_v35 = vsel %vm1037_vm11, %v1039_v58, %v1035_v21  ;;  %v1063_v22 = vsub.f32 %v2175_v51, %v2515_v6  ;;  %v600_v6 = vld [vmem:[#allocation5 + $0x18] sm:$0xff]  ;;  %v603_v37 = vsub.f32 0.0, %v599_v27 }
 0x1ab   :  { %v2648_v52 = vadd.f32 %v1130_v40, %v1058_v32  ;;  %v1112_v46 = vsel %vm1109_vm12, %v1111_v5, %v1107_v59  ;;  %v1041_v30 = vmul.f32 %v1040_v35, %v991_v39  ;;  %v604_v42 = vsub.f32 0.0, %v600_v6 }
 0x1ac   :  { %1137 = vrot.lane.b32.xlu1 %v2643_v43, %s1875_s0  ;;  %v1113_v12 = vmul.f32 %v1112_v46, %v1063_v22  ;;  %v607_v16 = vmax.f32 %v603_v37, 0.0  ;;  %v606_v56 = vsub.f32 0.0, %v602_v2  ;;  %v605_v17 = vsub.f32 0.0, %v601_v61 }
 0x1ad   :  { %1441 = vperm.xlu0 %1721, %v2648_v52   ;;  %v1059_v54 = vsub.f32 1.0, %v1041_v30  ;;  %v608_v7 = vmax.f32 %v604_v42, 0.0  ;;  %v2694_v10 = vadd.s32 769, %v2114_v14  ;;  %v2697_v26 = vadd.s32 769, %v2120_v31 }
 0x1ae   :  { %v1131_v55 = vsub.f32 1.0, %v1113_v12  ;;  %v610_v41 = vmax.f32 %v606_v56, 0.0  ;;  %v609_v36 = vmax.f32 %v605_v17, 0.0 }
 0x1af   :  { %v1274_v5 = vcvt.s32.f32 %v2697_v26 }
 0x1b0   :  { %v2664_v44 = vadd.f32 %v1131_v55, %v1059_v54  ;;  %v848_v18 = vpop.permute.xlu0 %847 }
 0x1b1   :  { %v857_v23 = vsel %vm560_vm5, %v852_v49, %v848_v18  ;;  %v855_v3 = vsel %vm560_vm5, %v848_v18, %v852_v49 }
 0x1b2   :  { %v869_v29 = vsel %vm2923_vm6, %v857_v23, %v2482_v8  ;;  %v874_v45 = vsub.f32 %v2455_v57, %v855_v3 }
 0x1b3   :  { %v873_v28 = vsub.f32 %v2444_v50, %v869_v29 }
 0x1b4   :  { %1141 = vrot.lane.b32.xlu1 %v2648_v52, %s1875_s0  ;;  %v878_v25 = vmul.f32 %v874_v45, %v608_v7 }
 0x1b5   :  { %v877_v4 = vmul.f32 %v873_v28, %v607_v16 }
 0x1b7   :  { %v881_v0 = vadd.f32 %v878_v25, %v877_v4 }
 0x1b8   :  { %v850_v63 = vpop.permute.xlu0 %849  ;;  %v1222_v11 = vpop.f32.mrf.mxu0 }
 0x1bc   :  { %1139 = vrot.lane.b32.xlu1 %v2664_v44, %s1875_s0 }
 0x1be   :  { %v1250_v21 = vpop.f32.mrf.mxu2 }
 0x1c0   :  { %v2691_v53 = vpop.permute.xlu0 %1156  ;;  %v1236_v58 = vpop.f32.mrf.mxu1 }
 0x1c1   :  { %v1224_v26 = vpop.f32.mrf.mxu0 }
 0x1c4   :  { %1143 = vrot.lane.b32.xlu1 %v2608_v13, %s1875_s0 }
 0x1c6   :  { %v1264_v35 = vpop.f32.mrf.mxu3  ;;  %v1252_v3 = vpop.f32.mrf.mxu2 }
 0x1d3   :  { %v2681_v34 = vpop.xlane.xlu1 %592 }
 0x1d7   :  { %882 = vadd.xlane.f32.xlu0 %v881_v0 }
 0x1eb   :  { %v854_v8 = vpop.permute.xlu1 %853 }
 0x1ec   :  { %v856_v50 = vsel %vm560_vm5, %v850_v63, %v854_v8  ;;  %v858_v57 = vsel %vm560_vm5, %v854_v8, %v850_v63 }
 0x1ed   :  { %v871_v24 = vsel %vm2923_vm6, %v858_v57, %v867_v15  ;;  %v876_v33 = vsub.f32 %v2484_v1, %v856_v50 }
 0x1ee   :  { %v875_v9 = vsub.f32 %v2471_v20, %v871_v24  ;;  %v1273_v20 = vcvt.s32.f32 %v2694_v10 }
 0x1ef   :  { %v880_v47 = vmul.f32 %v876_v33, %v610_v41 }
 0x1f0   :  { %v879_v32 = vmul.f32 %v875_v9, %v609_v36 }
 0x1f2   :  { %v884_v40 = vadd.f32 %v880_v47, %v879_v32 }
 0x1f4   :  { %885 = vadd.xlane.f32.xlu2 %v884_v40 }
 0x203   :  { %v1196_v62 = vpop.permute.xlu0 %1195 }
 0x204   :  { %v1223_v59 = vadd.f32 %v1222_v11, %v1196_v62  ;;  %v1251_v1 = vadd.f32 %v1250_v21, %v1196_v62 }
 0x206   :  { %v2701_v39 = vadd.f32 %v1264_v35, %v1251_v1  ;;  %v2703_v46 = vadd.f32 %v1236_v58, %v1223_v59 }
 0x208   :  { %v1356_v22 = vadd.f32 %v2701_v39, %v2124_v48  ;;  %v2710_v31 = vsub.f32 %v1273_v20, %v2703_v46  ;;  %v2714_v30 = vadd.f32 %v2703_v46, %v2124_v48  ;;  %1471 = vrot.lane.b32.xlu0 %v2701_v39, %s1875_s0  ;;  %v2721_v12 = vsub.f32 %v1274_v5, %v2701_v39 }
 0x209   :  { %v1279_v6 = vsub.f32 %v2116_v19, %v2703_v46  ;;  %v1280_v23 = vsub.f32 %v2116_v19, %v2701_v39 }
 0x20a   :  { %1771 = vrcp.f32 %v1356_v22  ;;  %v2725_v54 = vadd.f32 %v2710_v31, %v2116_v19  ;;  %v1284_v55 = vadd.f32 %v2721_v12, %v2116_v19  ;;  %v1383_v18 = vand.u32 2147483647, %v1356_v22 }
 0x20b   :  { %1773 = vrcp.f32 %v2714_v30  ;;  %v2731_v15 = vpop.permute.xlu0 %1200  ;;  %v1385_v49 = vand.u32 2147483648, %v1356_v22  ;;  %v1351_v29 = vsub.f32 %v2124_v48, %v2710_v31  ;;  %v1352_v28 = vsub.f32 %v2124_v48, %v2721_v12 }
 0x20c   :  { %1775 = vrcp.f32 %v2725_v54  ;;  %v1311_v37 = vand.u32 2147483647, %v1284_v55  ;;  %vm1379_vm13 = vweird.f32 %v1356_v22  ;;  %v1253_v4 = vadd.f32 %v1252_v3, %v2731_v15 }
 0x20d   :  { %1777 = vrcp.f32 %v1284_v55  ;;  %vm1307_vm14 = vweird.f32 %v1284_v55  ;;  %v1313_v25 = vand.u32 2147483648, %v1284_v55  ;;  %vm2743_vm4 = vcmp.eq.f32.partialorder %v1383_v18, 8.507059e+37 }
 0x20e   :  { %v1386_v56 = vor.u32 1.1754944e-38, %v1385_v49  ;;  %vm2748_vm15 = vcmp.eq.f32.partialorder %v1311_v37, 8.507059e+37  ;;  %vm1292_vm7 = vweird.f32 %v2725_v54  ;;  %v1296_v41 = vand.u32 2147483647, %v2725_v54 }
 0x20f   :  { %v1298_v36 = vand.u32 2147483648, %v2725_v54  ;;  %v1368_v9 = vand.u32 2147483647, %v2714_v30  ;;  %v1370_v40 = vand.u32 2147483648, %v2714_v30  ;;  %vm1364_vm10 = vweird.f32 %v2714_v30 }
 0x210   :  { %v1772_v27 = vpop.eup %1771 }
 0x211   :  { %v1774_v42 = vpop.eup %1773  ;;  %v1375_v45 = vmul.f32 %v1772_v27, %v1356_v22  ;;  %vm1380_vm1 = vweird.f32 %v1772_v27  ;;  %v1299_v59 = vor.u32 1.1754944e-38, %v1298_v36  ;;  %v1371_v1 = vor.u32 1.1754944e-38, %v1370_v40 }
 0x212   :  { %v1776_v16 = vpop.eup %1775  ;;  %v1360_v7 = vmul.f32 %v1774_v42, %v2714_v30  ;;  %vm1365_vm2 = vweird.f32 %v1774_v42  ;;  %vm1381_vm9 = vmor %vm1379_vm13, %vm1380_vm1  ;;  %vm1369_vm0 = vcmp.eq.f32.partialorder %v1368_v9, 8.507059e+37  ;;  %v1314_v22 = vor.u32 1.1754944e-38, %v1313_v25 }
 0x213   :  { %v1778_v0 = vpop.eup %1777  ;;  %v1376_v2 = vsub.f32 1.0, %v1375_v45  ;;  %v1288_v17 = vmul.f32 %v1776_v16, %v2725_v54  ;;  %vm1293_vm3 = vweird.f32 %v1776_v16  ;;  %vm1366_vm11 = vmor %vm1364_vm10, %vm1365_vm2  ;;  %vm1297_vm13 = vcmp.eq.f32.partialorder %v1296_v41, 8.507059e+37  ;;  %v1266_v45 = vpop.f32.mrf.mxu3 }
 0x214   :  { %v1361_v63 = vsub.f32 1.0, %v1360_v7  ;;  %v1303_v48 = vmul.f32 %v1778_v0, %v1284_v55  ;;  %vm1308_vm8 = vweird.f32 %v1778_v0  ;;  %vm1294_vm12 = vmor %vm1292_vm7, %vm1293_vm3 }
 0x215   :  { %v1377_v50 = vmul.f32 %v1772_v27, %v1376_v2  ;;  %v1289_v57 = vsub.f32 1.0, %v1288_v17  ;;  %vm1309_vm6 = vmor %vm1307_vm14, %vm1308_vm8 }
 0x216   :  { %v1304_v24 = vsub.f32 1.0, %v1303_v48  ;;  %v1362_v33 = vmul.f32 %v1774_v42, %v1361_v63  ;;  %v891_v63 = vld [vmem:[#allocation5 + $0x60] sm:$0xff] }
 0x217   :  { %v1378_v47 = vadd.f32 %v1772_v27, %v1377_v50  ;;  %v1290_v32 = vmul.f32 %v1776_v16, %v1289_v57  ;;  %v895_v50 = vsub.f32 0.0, %v891_v63 }
 0x218   :  { %v1305_v11 = vmul.f32 %v1778_v0, %v1304_v24  ;;  %v1363_v21 = vadd.f32 %v1774_v42, %v1362_v33 }
 0x219   :  { %v1382_v62 = vsel %vm1381_vm9, %v1772_v27, %v1378_v47  ;;  %v1291_v58 = vadd.f32 %v1776_v16, %v1290_v32  ;;  %v899_v32 = vmax.f32 %v895_v50, 0.0 }
 0x21a   :  { %v1306_v35 = vadd.f32 %v1778_v0, %v1305_v11  ;;  %v1387_v31 = vsel %vm2743_vm4, %v1386_v56, %v1382_v62  ;;  %v1367_v12 = vsel %vm1366_vm11, %v1774_v42, %v1363_v21  ;;  %v2769_v42 = vadd.f32 %v1266_v45, %v1253_v4  ;;  %v1238_v4 = vpop.f32.mrf.mxu1  ;;  %v892_v56 = vld [vmem:[#allocation5 + $0x68] sm:$0xff] }
 0x21b   :  { %v1295_v18 = vsel %vm1294_vm12, %v1776_v16, %v1291_v58  ;;  %v1372_v30 = vsel %vm1369_vm0, %v1371_v1, %v1367_v12  ;;  %v1388_v27 = vmul.f32 %v1387_v31, %v1352_v28  ;;  %v896_v41 = vsub.f32 0.0, %v892_v56  ;;  %v889_v31 = vld [vmem:[#allocation5 + $0x20] sm:$0xff] }
 0x21c   :  { %v1310_v49 = vsel %vm1309_vm6, %v1778_v0, %v1306_v35  ;;  %v1300_v37 = vsel %vm1297_vm13, %v1299_v59, %v1295_v18  ;;  %v1373_v3 = vmul.f32 %v1372_v30, %v1351_v29  ;;  %v2781_v46 = vsub.f32 %v1274_v5, %v2769_v42 }
 0x21d   :  { %v1315_v7 = vsel %vm2748_vm15, %v1314_v22, %v1310_v49  ;;  %v1301_v54 = vmul.f32 %v1300_v37, %v1279_v6  ;;  %v1420_v2 = vsub.f32 1.0, %v1388_v27  ;;  %v2793_v6 = vadd.f32 %v2769_v42, %v2175_v51  ;;  %v890_v22 = vld [vmem:[#allocation5 + $0x28] sm:$0xff] }
 0x21e   :  { %v1138_v55 = vpop.permute.xlu1 %1137  ;;  %v1316_v16 = vmul.f32 %v1315_v7, %v1280_v23  ;;  %v1419_v0 = vsub.f32 1.0, %v1373_v3  ;;  %v2789_v39 = vadd.f32 %v2781_v46, %v2132_v60  ;;  %v1225_v5 = vadd.f32 %v1224_v26, %v2731_v15 }
 0x21f   :  { %v1347_v25 = vsub.f32 1.0, %v1301_v54  ;;  %v900_v33 = vmax.f32 %v896_v41, 0.0  ;;  %vm2946_vm0 = vcmp.ge.s32.totalorder %v2114_v14, 1  ;;  %v894_v30 = vsub.f32 0.0, %v890_v22  ;;  %v2842_v7 = vpop.permute.xlu0 %1441  ;;  %v596_v22 = vpop.xlane.xlu2 %595  ;;  %v120_v54 = vld [vmem:[#allocation4 + $0x8] sm:$0xff] }
 0x220   :  { %v1348_v28 = vsub.f32 1.0, %v1316_v16  ;;  %1779 = vrcp.f32 %v2789_v39  ;;  %v2800_v8 = vadd.f32 %v1238_v4, %v1225_v5  ;;  %vm1337_vm14 = vweird.f32 %v2789_v39  ;;  %vm2947_vm4 = vmmov %vm2946_vm0 }
 0x221   :  { %v2774_v29 = vadd.f32 %v1419_v0, %v1347_v25  ;;  %1781 = vrcp.f32 %v2793_v6  ;;  %v1341_v49 = vand.u32 2147483647, %v2789_v39  ;;  %v1343_v27 = vand.u32 2147483648, %v2789_v39 }
 0x222   :  { %v2776_v61 = vadd.f32 %v1420_v2, %v1348_v28  ;;  %v2808_v15 = vsub.f32 %v1273_v20, %v2800_v8  ;;  %v2825_v59 = vadd.f32 %v2800_v8, %v2175_v51  ;;  %v1415_v16 = vand.u32 2147483648, %v2793_v6 }
 0x223   :  { %1427 = vrot.lane.b32.xlu2 %v2774_v29, %s1875_s0  ;;  %vm1409_vm1 = vweird.f32 %v2793_v6  ;;  %vm1342_vm3 = vcmp.eq.f32.partialorder %v1341_v49, 8.507059e+37 }
 0x224   :  { %1431 = vrot.lane.b32.xlu1 %v2776_v61, %s1875_s0  ;;  %v2821_v62 = vadd.f32 %v2808_v15, %v2132_v60  ;;  %v1416_v56 = vor.u32 1.1754944e-38, %v1415_v16  ;;  %vm1394_vm13 = vweird.f32 %v2825_v59  ;;  %v1353_v49 = vsub.f32 %v2175_v51, %v2808_v15 }
 0x226   :  { %v1142_v19 = vpop.permute.xlu1 %1141  ;;  %v1780_v17 = vpop.eup %1779  ;;  %1783 = vrcp.f32 %v2821_v62  ;;  %vm1322_vm10 = vweird.f32 %v2821_v62 }
 0x227   :  { %v2798_v48 = vpop.eup %1781  ;;  %v1333_v57 = vmul.f32 %v1780_v17, %v2789_v39  ;;  %1785 = vrcp.f32 %v2825_v59  ;;  %vm1338_vm6 = vweird.f32 %v1780_v17  ;;  %v1145_v37 = vsel %vm560_vm5, %v1138_v55, %v1142_v19 }
 0x228   :  { %v1405_v36 = vmul.f32 %v2798_v48, %v2793_v6  ;;  %vm1410_vm15 = vweird.f32 %v2798_v48  ;;  %vm2844_vm7 = vmor %vm1337_vm14, %vm1338_vm6  ;;  %v1164_v2 = vsub.f32 %v2648_v52, %v1145_v37  ;;  %v1344_v39 = vor.u32 1.1754944e-38, %v1343_v27 }
 0x229   :  { %v1334_v40 = vsub.f32 1.0, %v1333_v57  ;;  %vm1411_vm2 = vmor %vm1409_vm1, %vm1410_vm15  ;;  %vm2951_vm15 = vcmp.ge.s32.totalorder %v2114_v14, 1 }
 0x22a   :  { %v1406_v20 = vsub.f32 1.0, %v1405_v36  ;;  %vm2953_vm1 = vmmov %vm2951_vm15 }
 0x22b   :  { %v1335_v35 = vmul.f32 %v1780_v17, %v1334_v40 }
 0x22c   :  { %v1784_v0 = vpop.eup %1783 }
 0x22d   :  { %v1336_v18 = vadd.f32 %v1780_v17, %v1335_v35  ;;  %v1786_v26 = vpop.eup %1785  ;;  %vm1323_vm9 = vweird.f32 %v1784_v0  ;;  %v1400_v35 = vand.u32 2147483648, %v2825_v59 }
 0x22e   :  { %v1140_v23 = vpop.permute.xlu1 %1139  ;;  %v1390_v50 = vmul.f32 %v1786_v26, %v2825_v59  ;;  %vm1395_vm11 = vweird.f32 %v1786_v26  ;;  %vm1324_vm12 = vmor %vm1322_vm10, %vm1323_vm9 }
 0x236   :  { %v1144_v24 = vpop.permute.xlu1 %1143 }
 0x237   :  { %v1146_v9 = vsel %vm560_vm5, %v1140_v23, %v1144_v24  ;;  %v1148_v47 = vsel %vm560_vm5, %v1144_v24, %v1140_v23  ;;  %v119_v23 = vld [vmem:[#allocation4] sm:$0xff] }
 0x238   :  { %v1161_v11 = vsel %vm2946_vm0, %v1148_v47, %v2691_v53  ;;  %v1166_v21 = vsub.f32 %v2608_v13, %v1146_v9  ;;  %v1407_v53 = vmul.f32 %v2798_v48, %v1406_v20  ;;  %v1147_v13 = vsel %vm560_vm5, %v1142_v19, %v1138_v55  ;;  %vm1396_vm0 = vmor %vm1394_vm13, %vm1395_vm11 }
 0x239   :  { %v1165_v10 = vsub.f32 %v2664_v44, %v1161_v11  ;;  %v893_v44 = vsub.f32 0.0, %v889_v31  ;;  %v1159_v3 = vsel %vm2947_vm4, %v1147_v13, %v2679_v38  ;;  %v1340_v55 = vsel %vm2844_vm7, %v1780_v17, %v1336_v18 }
 0x23a   :  { %v1170_v58 = vmul.f32 %v1166_v21, %v900_v33  ;;  %v1408_v45 = vadd.f32 %v2798_v48, %v1407_v53  ;;  %v1413_v38 = vand.u32 2147483647, %v2793_v6  ;;  %v1163_v28 = vsub.f32 %v2643_v43, %v1159_v3  ;;  %v1447_v3 = vpop.permute.xlu2 %1446 }
 0x23b   :  { %v1169_v1 = vmul.f32 %v1165_v10, %v899_v32  ;;  %v897_v25 = vmax.f32 %v893_v44, 0.0  ;;  %v898_v19 = vmax.f32 %v894_v30, 0.0  ;;  %v1345_v4 = vsel %vm1342_vm3, %v1344_v39, %v1340_v55 }
 0x23c   :  { %v1412_v5 = vsel %vm1411_vm2, %v2798_v48, %v1408_v45  ;;  %v1282_v17 = vsub.f32 %v2132_v60, %v2769_v42  ;;  %vm1414_vm8 = vcmp.eq.f32.partialorder %v1413_v38, 8.507059e+37  ;;  %v1318_v6 = vmul.f32 %v1784_v0, %v2821_v62 }
 0x23d   :  { %v1174_v12 = vadd.f32 %v1170_v58, %v1169_v1  ;;  %v1167_v63 = vmul.f32 %v1163_v28, %v897_v25  ;;  %v1168_v43 = vmul.f32 %v1164_v2, %v898_v19  ;;  %v1417_v41 = vsel %vm1414_vm8, %v1416_v56, %v1412_v5 }
 0x23e   :  { %v597_v52 = vadd.f32 %v2681_v34, %v119_v23  ;;  %v1346_v57 = vmul.f32 %v1345_v4, %v1282_v17  ;;  %v1354_v48 = vsub.f32 %v2175_v51, %v2781_v46  ;;  %v1319_v9 = vsub.f32 1.0, %v1318_v6  ;;  %v1179_v51 = vld [vmem:[#allocation5 + $0x30] sm:$0xff] }
 0x23f   :  { %1175 = vadd.xlane.f32.xlu0 %v1174_v12  ;;  %v1171_v47 = vadd.f32 %v1168_v43, %v1167_v63  ;;  %v1391_v32 = vsub.f32 1.0, %v1390_v50  ;;  %v1328_v46 = vand.u32 2147483648, %v2821_v62  ;;  %v1326_v58 = vand.u32 2147483647, %v2821_v62 }
 0x240   :  { %v1418_v33 = vmul.f32 %v1417_v41, %v1354_v48  ;;  %v1350_v40 = vsub.f32 1.0, %v1346_v57  ;;  %v1320_v21 = vmul.f32 %v1784_v0, %v1319_v9  ;;  %v1398_v12 = vand.u32 2147483647, %v2825_v59  ;;  %v1182_v48 = vld [vmem:[#allocation5 + $0x78] sm:$0xff] }
 0x241   :  { %v1392_v34 = vmul.f32 %v1786_v26, %v1391_v32  ;;  %v1329_v53 = vor.u32 1.1754944e-38, %v1328_v46  ;;  %vm1327_vm6 = vcmp.eq.f32.partialorder %v1326_v58, 8.507059e+37  ;;  %v1401_v18 = vor.u32 1.1754944e-38, %v1400_v35 }
 0x242   :  { %v1422_v11 = vsub.f32 1.0, %v1418_v33  ;;  %v1321_v20 = vadd.f32 %v1784_v0, %v1320_v21  ;;  %v1281_v62 = vsub.f32 %v2132_v60, %v2800_v8  ;;  %vm1399_vm14 = vcmp.eq.f32.partialorder %v1398_v12, 8.507059e+37  ;;  %v1180_v8 = vld [vmem:[#allocation5 + $0x38] sm:$0xff] }
 0x243   :  { %v1393_v1 = vadd.f32 %v1786_v26, %v1392_v34  ;;  %v598_v25 = vadd.f32 %v596_v22, %v120_v54  ;;  %vm2950_vm4 = vcmask 7168   ;;  %v1184_v15 = vsub.f32 0.0, %v1180_v8 }
 0x244   :  { %v2865_v10 = vadd.f32 %v1422_v11, %v1350_v40  ;;  %v1325_v31 = vsel %vm1324_vm12, %v1784_v0, %v1321_v20  ;;  %v1183_v0 = vsub.f32 0.0, %v1179_v51  ;;  %vm2952_vm7 = vmmov %vm2950_vm4 }
 0x245   :  { %v1397_v13 = vsel %vm1396_vm0, %v1786_v26, %v1393_v1  ;;  %v1330_v44 = vsel %vm1327_vm6, %v1329_v53, %v1325_v31  ;;  %v1188_v19 = vmax.f32 %v1184_v15, 0.0  ;;  %vm2954_vm2 = vmmov %vm2950_vm4 }
 0x246   :  { %v1402_v30 = vsel %vm1399_vm14, %v1401_v18, %v1397_v13  ;;  %v1331_v27 = vmul.f32 %v1330_v44, %v1281_v62  ;;  %v1187_v5 = vmax.f32 %v1183_v0, 0.0  ;;  %vm2956_vm3 = vmmov %vm2954_vm2 }
 0x247   :  { %v1403_v37 = vmul.f32 %v1402_v30, %v1353_v49  ;;  %vm2957_vm8 = vmmov %vm2954_vm2 }
 0x248   :  { %v1349_v45 = vsub.f32 1.0, %v1331_v27  ;;  %vm2958_vm9 = vmmov %vm2954_vm2 }
 0x249   :  { %v1421_v59 = vsub.f32 1.0, %v1403_v37  ;;  %vm2959_vm10 = vmmov %vm2954_vm2 }
 0x24a   :  { %v883_v36 = vpop.xlane.xlu0 %882 }
 0x24b   :  { %v2863_v24 = vadd.f32 %v883_v36, %v597_v52  ;;  %v1425_v16 = vadd.f32 %v1421_v59, %v1349_v45  ;;  %v1186_v36 = vsub.f32 0.0, %v1182_v48 }
 0x24e   :  { %1172 = vadd.xlane.f32.xlu1 %v1171_v47 }
 0x253   :  { %1484 = vrot.lane.b32.xlu0 %v2865_v10, %s1875_s0 }
 0x267   :  { %1429 = vrot.lane.b32.xlu1 %v1425_v16, %s1875_s0  ;;  %v886_v55 = vpop.xlane.xlu2 %885 }
 0x268   :  { %v888_v38 = vadd.f32 %v886_v55, %v598_v25 }
 0x26f   :  { %1433 = vrot.lane.b32.xlu1 %v2865_v10, %s1875_s0 }
 0x27a   :  { %v1472_v60 = vpop.permute.xlu0 %1471 }
 0x27b   :  { %1478 = vst.msk [vmem:[#allocation2] sm:$0xff] %vm2950_vm4, %v1472_v60 }
 0x27d   :  { %v1428_v28 = vpop.permute.xlu2 %1427 }
 0x296   :  { %v1432_v2 = vpop.permute.xlu1 %1431 }
 0x297   :  { %v1435_v39 = vsel %vm560_vm5, %v1428_v28, %v1432_v2  ;;  %v1437_v26 = vsel %vm560_vm5, %v1432_v2, %v1428_v28 }
 0x298   :  { %v1449_v23 = vsel %vm2951_vm15, %v1437_v26, %v2842_v7  ;;  %v1454_v4 = vsub.f32 %v2776_v61, %v1435_v39  ;;  %v1181_v7 = vld [vmem:[#allocation5 + $0x70] sm:$0xff] }
 0x299   :  { %v1453_v56 = vsub.f32 %v2774_v29, %v1449_v23  ;;  %v1185_v33 = vsub.f32 0.0, %v1181_v7  ;;  %v1190_v29 = vmax.f32 %v1186_v36, 0.0 }
 0x29a   :  { %v1458_v17 = vmul.f32 %v1454_v4, %v1188_v19 }
 0x29b   :  { %v1457_v6 = vmul.f32 %v1453_v56, %v1187_v5  ;;  %v1189_v40 = vmax.f32 %v1185_v33, 0.0 }
 0x29d   :  { %v1461_v63 = vadd.f32 %v1458_v17, %v1457_v6 }
 0x29f   :  { %1462 = vadd.xlane.f32.xlu2 %v1461_v63 }
 0x2b2   :  { %v1176_v43 = vpop.xlane.xlu0 %1175 }
 0x2b3   :  { %v1178_v41 = vadd.f32 %v1176_v43, %v888_v38 }
 0x2b7   :  { %1473 = vrot.lane.b32.xlu2 %v2769_v42, %s1875_s0 }
 0x2c1   :  { %v1173_v50 = vpop.xlane.xlu1 %1172 }
 0x2c2   :  { %v1177_v58 = vadd.f32 %v1173_v50, %v2863_v24 }
 0x2c5   :  { %v1485_v52 = vpop.permute.xlu0 %1484 }
 0x2c6   :  { %1489 = vst.msk [vmem:[#allocation3 + $0x8] sm:$0xff] %vm2952_vm7, %v1485_v52 }
 0x2d9   :  { %v1430_v57 = vpop.permute.xlu1 %1429 }
 0x2e1   :  { %v1434_v9 = vpop.permute.xlu1 %1433 }
 0x2e2   :  { %v1436_v47 = vsel %vm560_vm5, %v1430_v57, %v1434_v9  ;;  %v1438_v32 = vsel %vm560_vm5, %v1434_v9, %v1430_v57  ;;  %vm2955_vm5 = vmmov %vm2954_vm2 }
 0x2e3   :  { %v1451_v42 = vsel %vm2953_vm1, %v1438_v32, %v1447_v3  ;;  %v1456_v11 = vsub.f32 %v2865_v10, %v1436_v47 }
 0x2e4   :  { %v1455_v21 = vsub.f32 %v1425_v16, %v1451_v42 }
 0x2e5   :  { %v1460_v34 = vmul.f32 %v1456_v11, %v1190_v29 }
 0x2e6   :  { %v1459_v20 = vmul.f32 %v1455_v21, %v1189_v40 }
 0x2e8   :  { %v1464_v46 = vadd.f32 %v1460_v34, %v1459_v20 }
 0x2ea   :  { %1465 = vadd.xlane.f32.xlu1 %v1464_v46 }
 0x303   :  { %1482 = vrot.lane.b32.xlu1 %v2776_v61, %s1875_s0 }
 0x312   :  { %v1463_v1 = vpop.xlane.xlu2 %1462 }
 0x313   :  { %v1467_v35 = vadd.f32 %v1463_v1, %v1177_v58 }
 0x315   :  { %1490 = vst.msk [vmem:[#allocation4] sm:$0xff] %vm2954_vm2, %v1467_v35 }
 0x31a   :  { %v1474_v31 = vpop.permute.xlu2 %1473 }
 0x31b   :  { %1479 = vst.msk [vmem:[#allocation2 + $0x8] sm:$0xff] %vm2955_vm5, %v1474_v31 }
 0x31c   :  { %v1495_v14 = vld [vmem:[#allocation4] sm:$0xff] }
 0x31d   :  { %1497 = vst.msk [vmem:[%s2921_s4] sm:$0xff] %vm2956_vm3, %v1495_v14 }
 0x35d   :  { %v1466_v10 = vpop.xlane.xlu1 %1465 }
 0x35e   :  { %v1468_v12 = vadd.f32 %v1466_v10, %v1178_v41 }
 0x360   :  { %1491 = vst.msk [vmem:[#allocation4 + $0x8] sm:$0xff] %vm2957_vm8, %v1468_v12 }
 0x367   :  { %v1496_v61 = vld [vmem:[#allocation4 + $0x8] sm:$0xff] }
 0x368   :  { %1498 = vst.msk [vmem:[%s2921_s4 + $0x8] sm:$0xff] %vm2958_vm9, %v1496_v61 }
 0x375   :  { %v1483_v24 = vpop.permute.xlu1 %1482 }
 0x376   :  { %1488 = vst.msk [vmem:[#allocation3] sm:$0xff] %vm2959_vm10, %v1483_v24 }
 0x377   :  { %1503 = vsyncpa [#allocation6], 1 }
 0x378   :  { %1504 = vsyncpa [#allocation8], 1 }

</bundles_post_ra>
